<compile_context>
chip_gen: v7x
topology: tpu7x:2x2x1
jax: 0.10.0
libtpu: 0.0.40
codegen_flags: <defaults>
</compile_context>

<pallas_src>
import functools

import jax
import jax.numpy as jnp
from jax.experimental import pallas as pl
from jax.experimental.pallas import tpu as pltpu

BN_EPS = 1e-5


# ----------------------------- Pallas kernel --------------------------------

def _pointnet_fused_kernel(x_ref, *refs, num_layers):
    """Fused PointNet forward for one (batch, point-tile) block.

    x_ref : (1, Cin0, TN)                  VMEM, f32
    refs  : num_layers weight refs (Cout_l, Cin_l)  bf16 (BN scale pre-folded)
            num_layers shift refs  (Cout_l, 1)      f32
            output ref             (1, Cout_last, TN)
    Channels sit on sublanes, points on lanes -> every matmul is lane-dense
    on its N (=TN) dimension and the output block is already in (B, C, N).
    """
    w_refs = refs[:num_layers]
    b_refs = refs[num_layers:2 * num_layers]
    o_ref = refs[2 * num_layers]

    h = x_ref[0].astype(jnp.bfloat16)                    # (Cin0, TN)
    for i in range(num_layers):                          # static unroll (5 layers)
        acc = jnp.dot(w_refs[i][...], h,                 # MXU, f32 accumulate
                      preferred_element_type=jnp.float32)
        acc = jnp.maximum(acc + b_refs[i][...], 0.0)     # BN shift + ReLU in f32
        h = acc.astype(jnp.bfloat16) if i + 1 < num_layers else acc
    o_ref[0] = h.astype(o_ref.dtype)


# ------------------------------- wrapper -------------------------------------

def _pick_point_tile(n, desired, multiple=128):
    """Largest multiple of `multiple` that divides n and is <= desired."""
    best = None
    t = multiple
    while t <= min(n, desired):
        if n % t == 0:
            best = t
        t += multiple
    return best


def pointnet_fused(x_bcn, weights, shifts, *, tile_n=1024):
    """x_bcn: (B, Cin0, N) f32.

    weights[l]: (Cout_l, Cin_l) bf16, BN scale already folded into rows.
    shifts[l] : (Cout_l, 1) f32.
    Returns (B, Cout_last, N) f32 in PyTorch layout.
    """
    B, cin0, N = x_bcn.shape
    num_layers = len(weights)
    cout_last = weights[-1].shape[0]

    tn = _pick_point_tile(N, desired=tile_n)
    n_pad = N
    if tn is None:
        if N <= tile_n:
            tn = N                                   # full-extent block (allowed)
        else:
            # Rare fallback: N has no multiple-of-128 divisor; pad + slice.
            tn = tile_n
            n_pad = pl.cdiv(N, tn) * tn
            x_bcn = jnp.pad(x_bcn, ((0, 0), (0, 0), (0, n_pad - N)))

    grid = (B, n_pad // tn)

    in_specs = [pl.BlockSpec((1, cin0, tn), lambda b, j: (b, 0, j))]
    for w in weights:                                 # weights resident in VMEM
        in_specs.append(pl.BlockSpec(w.shape, lambda b, j: (0, 0)))
    for s in shifts:
        in_specs.append(pl.BlockSpec(s.shape, lambda b, j: (0, 0)))

    total_pts = B * n_pad
    flops_per_pt = 2 * sum(w.shape[0] * w.shape[1] for w in weights)
    cost = pl.CostEstimate(
        flops=flops_per_pt * total_pts,
        transcendentals=0,
        bytes_accessed=(total_pts * cin0 * 4            # input read
                        + total_pts * cout_last * 4     # output write
                        + sum(int(w.size) for w in weights) * 2),
    )

    out = pl.pallas_call(
        functools.partial(_pointnet_fused_kernel, num_layers=num_layers),
        out_shape=jax.ShapeDtypeStruct((B, cout_last, n_pad), jnp.float32),
        grid=grid,
        in_specs=in_specs,
        out_specs=pl.BlockSpec((1, cout_last, tn), lambda b, j: (b, 0, j)),
        compiler_params=pltpu.CompilerParams(
            dimension_semantics=("parallel", "parallel"),
            vmem_limit_bytes=32 * 1024 * 1024),
        cost_estimate=cost,
    )(x_bcn, *weights, *shifts)

    if n_pad != N:
        out = out[:, :, :N]
    return out


# --------------------------- parameters & forward ----------------------------

def init_pointnet_params(key, emb_dims=512):
    """Deterministic synthetic parameters mirroring PointNet.__init__."""
    channels = [3, 64, 64, 64, 128, emb_dims]
    n_layers = len(channels) - 1
    keys = jax.random.split(key, 5 * n_layers)
    params = []
    ki = 0
    for i in range(n_layers):
        cin, cout = channels[i], channels[i + 1]
        w = 0.1 * jax.random.normal(keys[ki], (cout, cin, 1), jnp.float32); ki += 1
        gamma = 1.0 + 0.1 * jax.random.normal(keys[ki], (cout,), jnp.float32); ki += 1
        beta = 0.1 * jax.random.normal(keys[ki], (cout,), jnp.float32); ki += 1
        mean = 0.05 * jax.random.normal(keys[ki], (cout,), jnp.float32); ki += 1
        var = jax.random.uniform(keys[ki], (cout,), jnp.float32, 0.5, 1.5); ki += 1
        params.append(dict(w=w, gamma=gamma, beta=beta, mean=mean, var=var))
    return params


def pointnet_forward(params, x_bcn, *, tile_n=1024):
    """Matches PointNet.forward: (B, 3, N) in -> (B, emb_dims, N) out."""
    weights, shifts = [], []
    for layer in params:
        w = layer["w"][:, :, 0]                                    # (Cout, Cin)
        scale = layer["gamma"] * jax.lax.rsqrt(layer["var"] + BN_EPS)
        shift = layer["beta"] - layer["mean"] * scale
        # Fold BN scale into the weight rows: (x@W)*s + b == x@(W*s) + b.
        weights.append((w * scale[:, None]).astype(jnp.bfloat16))
        shifts.append(shift.reshape(-1, 1).astype(jnp.float32))
    return pointnet_fused(x_bcn, weights, shifts, tile_n=tile_n)


# ------------------------------ pure-JAX reference ---------------------------

def pointnet_reference(params, x_bcn):
    h = x_bcn
    for layer in params:
        w = layer["w"][:, :, 0]                                    # (Cout, Cin)
        h = jnp.einsum("oc,bcn->bon", w, h,
                       precision=jax.lax.Precision.HIGHEST)
        scale = layer["gamma"] * jax.lax.rsqrt(layer["var"] + BN_EPS)
        shift = layer["beta"] - layer["mean"] * scale
        h = jnp.maximum(h * scale[None, :, None] + shift[None, :, None], 0.0)
    return h


# ----------------------------------- main ------------------------------------

if __name__ == "__main__":
    emb_dims = 512
    B, N = 2, 256                                  # small: 512 points total

    key = jax.random.PRNGKey(0)
    k_param, k_x = jax.random.split(key)
    params = init_pointnet_params(k_param, emb_dims=emb_dims)

    # PyTorch-convention input: (batch, 3, num_points)
    x = jax.random.normal(k_x, (B, 3, N), jnp.float32)

    out = pointnet_forward(params, x)
    out = jax.block_until_ready(out)

    ref = pointnet_reference(params, x)
    assert out.shape == ref.shape == (B, emb_dims, N), out.shape
    # bf16 MXU operands (f32 accumulate) vs HIGHEST-precision f32 reference.
    max_err = float(jnp.max(jnp.abs(out - ref)))
    assert max_err < 5e-2, max_err

    print("KERNEL_OK")
</pallas_src>

<mosaic_0001>
module attributes {stable_mosaic.version = 11 : i64} {
  func.func @_pointnet_fused_kernel(%arg0: i32, %arg1: i32, %arg2: memref<1x3x256xf32, #tpu.memory_space<vmem>>, %arg3: memref<64x3xbf16, #tpu.memory_space<vmem>>, %arg4: memref<64x64xbf16, #tpu.memory_space<vmem>>, %arg5: memref<64x64xbf16, #tpu.memory_space<vmem>>, %arg6: memref<128x64xbf16, #tpu.memory_space<vmem>>, %arg7: memref<512x128xbf16, #tpu.memory_space<vmem>>, %arg8: memref<64x1xf32, #tpu.memory_space<vmem>>, %arg9: memref<64x1xf32, #tpu.memory_space<vmem>>, %arg10: memref<64x1xf32, #tpu.memory_space<vmem>>, %arg11: memref<128x1xf32, #tpu.memory_space<vmem>>, %arg12: memref<512x1xf32, #tpu.memory_space<vmem>>, %arg13: memref<1x512x256xf32, #tpu.memory_space<vmem>>) attributes {dimension_semantics = [#tpu.dimension_semantics<parallel>, #tpu.dimension_semantics<parallel>], iteration_bounds = array<i64: 2, 1>, scalar_prefetch = 0 : i64, scratch_operands = 0 : i64, tpu.core_type = #tpu.core_type<tc>, window_params = [{transform_indices = @transform_0, window_bounds = array<i64: 1, 3, 256>}, {pipeline_mode = #tpu.pipeline_mode<synchronous>, transform_indices = @transform_1, window_bounds = array<i64: 64, 3>}, {pipeline_mode = #tpu.pipeline_mode<synchronous>, transform_indices = @transform_2, window_bounds = array<i64: 64, 64>}, {pipeline_mode = #tpu.pipeline_mode<synchronous>, transform_indices = @transform_3, window_bounds = array<i64: 64, 64>}, {pipeline_mode = #tpu.pipeline_mode<synchronous>, transform_indices = @transform_4, window_bounds = array<i64: 128, 64>}, {pipeline_mode = #tpu.pipeline_mode<synchronous>, transform_indices = @transform_5, window_bounds = array<i64: 512, 128>}, {pipeline_mode = #tpu.pipeline_mode<synchronous>, transform_indices = @transform_6, window_bounds = array<i64: 64, 1>}, {pipeline_mode = #tpu.pipeline_mode<synchronous>, transform_indices = @transform_7, window_bounds = array<i64: 64, 1>}, {pipeline_mode = #tpu.pipeline_mode<synchronous>, transform_indices = @transform_8, window_bounds = array<i64: 64, 1>}, {pipeline_mode = #tpu.pipeline_mode<synchronous>, transform_indices = @transform_9, window_bounds = array<i64: 128, 1>}, {pipeline_mode = #tpu.pipeline_mode<synchronous>, transform_indices = @transform_10, window_bounds = array<i64: 512, 1>}, {transform_indices = @transform_11, window_bounds = array<i64: 1, 512, 256>}]} {
    %c0 = arith.constant 0 : index
    %c0_0 = arith.constant 0 : index
    %c0_1 = arith.constant 0 : index
    %0 = vector.load %arg2[%c0, %c0_0, %c0_1] : memref<1x3x256xf32, #tpu.memory_space<vmem>>, vector<1x3x256xf32>
    %1 = vector.shape_cast %0 : vector<1x3x256xf32> to vector<3x256xf32>
    %2 = arith.truncf %1 : vector<3x256xf32> to vector<3x256xbf16>
    %c0_2 = arith.constant 0 : index
    %c0_3 = arith.constant 0 : index
    %3 = vector.load %arg3[%c0_2, %c0_3] : memref<64x3xbf16, #tpu.memory_space<vmem>>, vector<64x3xbf16>
    %cst = arith.constant dense<0.000000e+00> : vector<64x256xf32>
    %4 = tpu.matmul %3, %2, %cst {dimension_numbers = #tpu.dot_dimension_numbers<[1], [0], [0], [1], [0, 0, 1, 1], [], []>} : vector<64x3xbf16>, vector<3x256xbf16>, vector<64x256xf32> -> vector<64x256xf32>
    %c0_4 = arith.constant 0 : index
    %c0_5 = arith.constant 0 : index
    %5 = vector.load %arg8[%c0_4, %c0_5] : memref<64x1xf32, #tpu.memory_space<vmem>>, vector<64x1xf32>
    %6 = vector.broadcast %5 : vector<64x1xf32> to vector<64x256xf32>
    %7 = arith.addf %4, %6 : vector<64x256xf32>
    %cst_6 = arith.constant 0.000000e+00 : f32
    %8 = vector.broadcast %cst_6 : f32 to vector<64x256xf32>
    %9 = arith.maximumf %7, %8 : vector<64x256xf32>
    %10 = arith.truncf %9 : vector<64x256xf32> to vector<64x256xbf16>
    %c0_7 = arith.constant 0 : index
    %c0_8 = arith.constant 0 : index
    %11 = vector.load %arg4[%c0_7, %c0_8] : memref<64x64xbf16, #tpu.memory_space<vmem>>, vector<64x64xbf16>
    %cst_9 = arith.constant dense<0.000000e+00> : vector<64x256xf32>
    %12 = tpu.matmul %11, %10, %cst_9 {dimension_numbers = #tpu.dot_dimension_numbers<[1], [0], [0], [1], [0, 0, 1, 1], [], []>} : vector<64x64xbf16>, vector<64x256xbf16>, vector<64x256xf32> -> vector<64x256xf32>
    %c0_10 = arith.constant 0 : index
    %c0_11 = arith.constant 0 : index
    %13 = vector.load %arg9[%c0_10, %c0_11] : memref<64x1xf32, #tpu.memory_space<vmem>>, vector<64x1xf32>
    %14 = vector.broadcast %13 : vector<64x1xf32> to vector<64x256xf32>
    %15 = arith.addf %12, %14 : vector<64x256xf32>
    %cst_12 = arith.constant 0.000000e+00 : f32
    %16 = vector.broadcast %cst_12 : f32 to vector<64x256xf32>
    %17 = arith.maximumf %15, %16 : vector<64x256xf32>
    %18 = arith.truncf %17 : vector<64x256xf32> to vector<64x256xbf16>
    %c0_13 = arith.constant 0 : index
    %c0_14 = arith.constant 0 : index
    %19 = vector.load %arg5[%c0_13, %c0_14] : memref<64x64xbf16, #tpu.memory_space<vmem>>, vector<64x64xbf16>
    %cst_15 = arith.constant dense<0.000000e+00> : vector<64x256xf32>
    %20 = tpu.matmul %19, %18, %cst_15 {dimension_numbers = #tpu.dot_dimension_numbers<[1], [0], [0], [1], [0, 0, 1, 1], [], []>} : vector<64x64xbf16>, vector<64x256xbf16>, vector<64x256xf32> -> vector<64x256xf32>
    %c0_16 = arith.constant 0 : index
    %c0_17 = arith.constant 0 : index
    %21 = vector.load %arg10[%c0_16, %c0_17] : memref<64x1xf32, #tpu.memory_space<vmem>>, vector<64x1xf32>
    %22 = vector.broadcast %21 : vector<64x1xf32> to vector<64x256xf32>
    %23 = arith.addf %20, %22 : vector<64x256xf32>
    %cst_18 = arith.constant 0.000000e+00 : f32
    %24 = vector.broadcast %cst_18 : f32 to vector<64x256xf32>
    %25 = arith.maximumf %23, %24 : vector<64x256xf32>
    %26 = arith.truncf %25 : vector<64x256xf32> to vector<64x256xbf16>
    %c0_19 = arith.constant 0 : index
    %c0_20 = arith.constant 0 : index
    %27 = vector.load %arg6[%c0_19, %c0_20] : memref<128x64xbf16, #tpu.memory_space<vmem>>, vector<128x64xbf16>
    %cst_21 = arith.constant dense<0.000000e+00> : vector<128x256xf32>
    %28 = tpu.matmul %27, %26, %cst_21 {dimension_numbers = #tpu.dot_dimension_numbers<[1], [0], [0], [1], [0, 0, 1, 1], [], []>} : vector<128x64xbf16>, vector<64x256xbf16>, vector<128x256xf32> -> vector<128x256xf32>
    %c0_22 = arith.constant 0 : index
    %c0_23 = arith.constant 0 : index
    %29 = vector.load %arg11[%c0_22, %c0_23] : memref<128x1xf32, #tpu.memory_space<vmem>>, vector<128x1xf32>
    %30 = vector.broadcast %29 : vector<128x1xf32> to vector<128x256xf32>
    %31 = arith.addf %28, %30 : vector<128x256xf32>
    %cst_24 = arith.constant 0.000000e+00 : f32
    %32 = vector.broadcast %cst_24 : f32 to vector<128x256xf32>
    %33 = arith.maximumf %31, %32 : vector<128x256xf32>
    %34 = arith.truncf %33 : vector<128x256xf32> to vector<128x256xbf16>
    %c0_25 = arith.constant 0 : index
    %c0_26 = arith.constant 0 : index
    %35 = vector.load %arg7[%c0_25, %c0_26] : memref<512x128xbf16, #tpu.memory_space<vmem>>, vector<512x128xbf16>
    %cst_27 = arith.constant dense<0.000000e+00> : vector<512x256xf32>
    %36 = tpu.matmul %35, %34, %cst_27 {dimension_numbers = #tpu.dot_dimension_numbers<[1], [0], [0], [1], [0, 0, 1, 1], [], []>} : vector<512x128xbf16>, vector<128x256xbf16>, vector<512x256xf32> -> vector<512x256xf32>
    %c0_28 = arith.constant 0 : index
    %c0_29 = arith.constant 0 : index
    %37 = vector.load %arg12[%c0_28, %c0_29] : memref<512x1xf32, #tpu.memory_space<vmem>>, vector<512x1xf32>
    %38 = vector.broadcast %37 : vector<512x1xf32> to vector<512x256xf32>
    %39 = arith.addf %36, %38 : vector<512x256xf32>
    %cst_30 = arith.constant 0.000000e+00 : f32
    %40 = vector.broadcast %cst_30 : f32 to vector<512x256xf32>
    %41 = arith.maximumf %39, %40 : vector<512x256xf32>
    %c0_31 = arith.constant 0 : index
    %c0_32 = arith.constant 0 : index
    %c0_33 = arith.constant 0 : index
    %42 = vector.load %arg13[%c0_31, %c0_32, %c0_33] : memref<1x512x256xf32, #tpu.memory_space<vmem>>, vector<1x512x256xf32>
    %43 = vector.shape_cast %42 : vector<1x512x256xf32> to vector<512x256xf32>
    %44 = vector.shape_cast %41 : vector<512x256xf32> to vector<1x512x256xf32>
    tpu.vector_store %arg13[%c0_31, %c0_32, %c0_33], %44 {strides = array<i32>} : memref<1x512x256xf32, #tpu.memory_space<vmem>>, vector<1x512x256xf32>,
    return
  }
  func.func @transform_0(%arg0: i32, %arg1: i32) -> (i32, i32, i32) {
    %c0_i32 = arith.constant 0 : i32
    %c0_i32_0 = arith.constant 0 : i32
    return %arg0, %c0_i32, %arg1 : i32, i32, i32
  }
  func.func @transform_1(%arg0: i32, %arg1: i32) -> (i32, i32) {
    %c0_i32 = arith.constant 0 : i32
    %c0_i32_0 = arith.constant 0 : i32
    %c0_i32_1 = arith.constant 0 : i32
    return %c0_i32, %c0_i32_0 : i32, i32
  }
  func.func @transform_2(%arg0: i32, %arg1: i32) -> (i32, i32) {
    %c0_i32 = arith.constant 0 : i32
    %c0_i32_0 = arith.constant 0 : i32
    %c0_i32_1 = arith.constant 0 : i32
    return %c0_i32, %c0_i32_0 : i32, i32
  }
  func.func @transform_3(%arg0: i32, %arg1: i32) -> (i32, i32) {
    %c0_i32 = arith.constant 0 : i32
    %c0_i32_0 = arith.constant 0 : i32
    %c0_i32_1 = arith.constant 0 : i32
    return %c0_i32, %c0_i32_0 : i32, i32
  }
  func.func @transform_4(%arg0: i32, %arg1: i32) -> (i32, i32) {
    %c0_i32 = arith.constant 0 : i32
    %c0_i32_0 = arith.constant 0 : i32
    %c0_i32_1 = arith.constant 0 : i32
    return %c0_i32, %c0_i32_0 : i32, i32
  }
  func.func @transform_5(%arg0: i32, %arg1: i32) -> (i32, i32) {
    %c0_i32 = arith.constant 0 : i32
    %c0_i32_0 = arith.constant 0 : i32
    %c0_i32_1 = arith.constant 0 : i32
    return %c0_i32, %c0_i32_0 : i32, i32
  }
  func.func @transform_6(%arg0: i32, %arg1: i32) -> (i32, i32) {
    %c0_i32 = arith.constant 0 : i32
    %c0_i32_0 = arith.constant 0 : i32
    %c0_i32_1 = arith.constant 0 : i32
    return %c0_i32, %c0_i32_0 : i32, i32
  }
  func.func @transform_7(%arg0: i32, %arg1: i32) -> (i32, i32) {
    %c0_i32 = arith.constant 0 : i32
    %c0_i32_0 = arith.constant 0 : i32
    %c0_i32_1 = arith.constant 0 : i32
    return %c0_i32, %c0_i32_0 : i32, i32
  }
  func.func @transform_8(%arg0: i32, %arg1: i32) -> (i32, i32) {
    %c0_i32 = arith.constant 0 : i32
    %c0_i32_0 = arith.constant 0 : i32
    %c0_i32_1 = arith.constant 0 : i32
    return %c0_i32, %c0_i32_0 : i32, i32
  }
  func.func @transform_9(%arg0: i32, %arg1: i32) -> (i32, i32) {
    %c0_i32 = arith.constant 0 : i32
    %c0_i32_0 = arith.constant 0 : i32
    %c0_i32_1 = arith.constant 0 : i32
    return %c0_i32, %c0_i32_0 : i32, i32
  }
  func.func @transform_10(%arg0: i32, %arg1: i32) -> (i32, i32) {
    %c0_i32 = arith.constant 0 : i32
    %c0_i32_0 = arith.constant 0 : i32
    %c0_i32_1 = arith.constant 0 : i32
    return %c0_i32, %c0_i32_0 : i32, i32
  }
  func.func @transform_11(%arg0: i32, %arg1: i32) -> (i32, i32, i32) {
    %c0_i32 = arith.constant 0 : i32
    %c0_i32_0 = arith.constant 0 : i32
    return %arg0, %c0_i32, %arg1 : i32, i32, i32
  }
}

</mosaic_0001>

<bundles_post_ra>
// kernel: tpu_custom_call.1
= control target key start
LH: loop header
LB: loop body
LE: loop exit
PB: predicated region body
PF: predicated region fallthrough
CT: control target
= control target key end

     0   :  { %s3977_s0 = inlined_call_operand.vmem [shape: f32[2,3,256], index: 0, kind: input, shape index: {}]   ;;  %s3978_s1 = inlined_call_operand.vmem [shape: bf16[64,3], index: 1, kind: input, shape index: {}]   ;;  %s3979_s2 = inlined_call_operand.vmem [shape: bf16[64,64], index: 2, kind: input, shape index: {}]   ;;  %s3980_s3 = inlined_call_operand.vmem [shape: bf16[64,64], index: 3, kind: input, shape index: {}]   ;;  %s3981_s4 = inlined_call_operand.vmem [shape: bf16[128,64], index: 4, kind: input, shape index: {}]   ;;  %s3982_s5 = inlined_call_operand.vmem [shape: bf16[512,128], index: 5, kind: input, shape index: {}]   ;;  %s3983_s6 = inlined_call_operand.vmem [shape: f32[64,1], index: 6, kind: input, shape index: {}]   ;;  %s3984_s7 = inlined_call_operand.vmem [shape: f32[64,1], index: 7, kind: input, shape index: {}]   ;;  %s3985_s8 = inlined_call_operand.vmem [shape: f32[64,1], index: 8, kind: input, shape index: {}]   ;;  %s3986_s9 = inlined_call_operand.vmem [shape: f32[128,1], index: 9, kind: input, shape index: {}]   ;;  %s3987_s10 = inlined_call_operand.vmem [shape: f32[512,1], index: 10, kind: input, shape index: {}]   ;;  %s3988_s11 = inlined_call_operand.hbm [shape: f32[2,512,256], index: 11, kind: output, shape index: {}]  }
   0x1   :  { %3989 = sst [smem:[#allocation5_spill]] %s3977_s0 }
   0x2   :  { %16 = vsyncpa [#allocation3], 0 }
   0x3   :  { %18 = vsyncpa [#allocation3 + $0x1], 0  ;;  %s3033_s17 = smov 0   ;;  %s3035_s18 = smov 0  }
   0x4   :  { %s3037_s19 = smov 0   ;;  %s3039_s20 = smov 0  }
   0x5   :  { %s3041_s21 = smov 0   ;;  %s3043_s22 = smov 0  }
   0x6 LB: > { %s2671_s23 = sadd.s32 4294967295, %s2966_s22   ;;  %s2672_s24 = sadd.s32 4294967294, %s2966_s22   ;;  %s2966_s22 = sphi %s3043_s22, %s24_s22   ;;  %s2962_s21 = sphi %s3041_s21, %s3997_s21   ;;  %s2958_s20 = sphi %s3039_s20, %s3996_s20   ;;  %s2954_s19 = sphi %s3037_s19, %s3995_s19   ;;  %s2950_s18 = sphi %s3035_s18, %s3994_s18   ;;  %s2946_s17 = sphi %s3033_s17, %s3993_s17  }
   0x7   : > { %s36_s25 = sadd.s32 1, %s2962_s21  ;;  %s283_s26 = sadd.s32 1, %s2954_s19 }
   0x8   : > { %p38_p0 = scmp.ge.s32.totalorder %s36_s25, 2  ;;  %p293_p1 = scmp.ne.s32.totalorder %s2954_s19, %s2950_s18 }
   0x9   : > { %p294_p2 = scmp.eq.s32.totalorder %s2671_s23, 1  ;;  %p299_p3 = scmp.ne.s32.totalorder %s2950_s18, %s2946_s17 }
   0xa   : > { %s3999_s25 = smov (%p38_p0, %s36_s25), 0  ;;  %p300_p5 = scmp.eq.s32.totalorder %s2672_s24, 1 }
   0xb   : > { %p3073_p4 = por %p294_p2, %p293_p1  ;;  %s278_s28 = ssub.s32 %s2962_s21, %s3999_s25 }
   0xc   : > { %p2675_p6 = scmp.ge.s32.totalorder %s2966_s22, 1  ;;  %p281_p7 = scmp.eq.s32.totalorder %s278_s28, 0 }
   0xd   : > { %p3080_p8 = por %p300_p5, %p299_p3  ;;  %p361_p9 = scmp.lt.s32.totalorder %s2966_s22, 3 }
   0xe   : > { %s3086_s30 = scalar_select %p281_p7, %s2954_s19, %s283_s26  }
   0xf   : > { %p362_p10 = pnand %p2675_p6, %p361_p9 }
  0x10   : > { %v433_v0 = vld [vmem:[%s3983_s6 + $0x10] sm:$0xff] (!%p362_p10)  ;;  %v431_v1 = vld [vmem:[%s3983_s6] sm:$0xff] (!%p362_p10)  ;;  %p406_p11 = scmp.lt.s32.totalorder (!%p362_p10), %s2958_s20, 1  ;;  %v2968_v2 = vmov (!%p362_p10), 0   ;;  %vm512_vm0 = vcmask (!%p362_p10), 1040384   ;;  %v434_v3 = vld [vmem:[%s3983_s6 + $0x18] sm:$0xff] (!%p362_p10) }
  0x11   : > { %365 = sbr.rel (%p362_p10) target bundleno = 1445 (0x5a5), region = 64  ;;  %2834 = vset.pattern.permute.xlu1 (!%p362_p10), %v2968_v2  ;;  %2833 = vset.pattern.permute.xlu0 (!%p362_p10), %v2968_v2  ;;  %v432_v4 = vld [vmem:[%s3983_s6 + $0x8] sm:$0xff] (!%p362_p10)  ;;  %s3992_s0 = sld [smem:[#allocation5_spill]] (!%p362_p10)  ;;  %vm513_vm1 = vcmask (!%p362_p10), 1041408   ;;  %v2969_v5 = vmov (!%p362_p10), 65535   ;;  %v435_v9 = vld [vmem:[%s3983_s6 + $0x20] sm:$0xff] (!%p362_p10) }
  0x12   : > { %451 = vperm.xlu1 (!%p362_p10), %2834, %v433_v0   ;;  %441 = vperm.xlu0 (!%p362_p10), %2833, %v431_v1   ;;  %v514_v6 = vsel (!%p362_p10), %vm512_vm0, 4294967295, %v2969_v5  ;;  %v436_v8 = vld [vmem:[%s3983_s6 + $0x28] sm:$0xff] (!%p362_p10)  ;;  %v438_v15 = vld [vmem:[%s3983_s6 + $0x38] sm:$0xff] (!%p362_p10)  ;;  %v437_v16 = vld [vmem:[%s3983_s6 + $0x30] sm:$0xff] (!%p362_p10)  ;;  %vm499_vm2 = vcmask (!%p362_p10), 23552   ;;  %vm695_vm3 = vcmask (!%p362_p10), 523264  }
  0x13   : > { %554 = vmatprep.mubr.bf16.mxu0 (!%p362_p10), %v2968_v2  ;;  %740 = vmatprep.mubr.bf16.mxu1 (!%p362_p10), %v2968_v2  ;;  %v515_v12 = vsel (!%p362_p10), %vm513_vm1, %v514_v6, 0  ;;  %v2836_v18 = vld [vmem:[%s3978_s1] sm:$0xff] (!%p362_p10)   ;;  %v628_v19 = vld [vmem:[%s3984_s7 + $0x8] sm:$0xff] (!%p362_p10)  ;;  %v630_v21 = vld [vmem:[%s3984_s7 + $0x18] sm:$0xff] (!%p362_p10) }
  0x14   : > { %v627_v20 = vld [vmem:[%s3984_s7] sm:$0xff] (!%p362_p10)  ;;  %v629_v22 = vld [vmem:[%s3984_s7 + $0x10] sm:$0xff] (!%p362_p10)  ;;  %v2837_v23 = vld [vmem:[%s3978_s1 + $0x8] sm:$0xff] (!%p362_p10)  }
  0x15   : > { %v632_v24 = vld [vmem:[%s3984_s7 + $0x28] sm:$0xff] (!%p362_p10)  ;;  %v631_v25 = vld [vmem:[%s3984_s7 + $0x20] sm:$0xff] (!%p362_p10)  ;;  %v634_v26 = vld [vmem:[%s3984_s7 + $0x38] sm:$0xff] (!%p362_p10) }
  0x16   : > { %456 = vperm.xlu1 (!%p362_p10), %2834, %v434_v3   ;;  %446 = vperm.xlu0 (!%p362_p10), %2833, %v432_v4   ;;  %v633_v27 = vld [vmem:[%s3984_s7 + $0x30] sm:$0xff] (!%p362_p10)  ;;  %v814_v29 = vld [vmem:[%s3985_s8 + $0x8] sm:$0xff] (!%p362_p10)  ;;  %v813_v30 = vld [vmem:[%s3985_s8] sm:$0xff] (!%p362_p10) }
  0x17   : > { %v2838_v28 = vld [vmem:[%s3978_s1 + $0x10] sm:$0xff] (!%p362_p10)   ;;  %v816_v31 = vld [vmem:[%s3985_s8 + $0x18] sm:$0xff] (!%p362_p10)  ;;  %v818_v34 = vld [vmem:[%s3985_s8 + $0x28] sm:$0xff] (!%p362_p10) }
  0x18   : > { %s407_s16 = scalar_select %p406_p11, %s2958_s20, 1  ;;  %v815_v32 = vld [vmem:[%s3985_s8 + $0x10] sm:$0xff]  ;;  %v2839_v33 = vld [vmem:[%s3978_s1 + $0x18] sm:$0xff]   ;;  %v817_v35 = vld [vmem:[%s3985_s8 + $0x20] sm:$0xff] }
  0x19   : > { %v820_v36 = vld [vmem:[%s3985_s8 + $0x38] sm:$0xff]  ;;  %v819_v37 = vld [vmem:[%s3985_s8 + $0x30] sm:$0xff]  ;;  %v1007_v38 = vld [vmem:[%s3986_s9 + $0x8] sm:$0xff] }
  0x1a   : > { %s2756_s12 = sshll.u32 %s407_s16, 3  ;;  %466 = vperm.xlu1 %2834, %v436_v8   ;;  %461 = vperm.xlu0 %2833, %v435_v9   ;;  %v1006_v39 = vld [vmem:[%s3986_s9] sm:$0xff]  ;;  %v1009_v40 = vld [vmem:[%s3986_s9 + $0x18] sm:$0xff]  ;;  %v1008_v41 = vld [vmem:[%s3986_s9 + $0x10] sm:$0xff]  ;;  %s2970_s16 = smov [#allocation2]  }
  0x1b   : > { %s413_s15 = scalar_lea.vmem %s3992_s0, %s2756_s12  ;;  %v1011_v42 = vld [vmem:[%s3986_s9 + $0x28] sm:$0xff]  ;;  %v1010_v43 = vld [vmem:[%s3986_s9 + $0x20] sm:$0xff]  ;;  %v1013_v44 = vld [vmem:[%s3986_s9 + $0x38] sm:$0xff]  ;;  %s402_s12 = sand.u32 1, %s2950_s18  }
  0x1c   : > { %v417_v7 = vld [vmem:[%s413_s15] sm:$0x77]  ;;  %v1012_v45 = vld [vmem:[%s3986_s9 + $0x30] sm:$0xff]  ;;  %v1015_v46 = vld [vmem:[%s3986_s9 + $0x48] sm:$0xff]  ;;  %s2676_s13 = sshll.u32 %s402_s12, 10  ;;  %s2757_s15 = sshll.u32 %s2958_s20, 14 }
  0x1d   : > { %v419_v10 = vcombine.high %v417_v7, %v417_v7  ;;  %v421_v11 = vpack.c.bf16 %v417_v7, %v417_v7  ;;  %v1014_v47 = vld [vmem:[%s3986_s9 + $0x40] sm:$0xff]  ;;  %v1017_v48 = vld [vmem:[%s3986_s9 + $0x58] sm:$0xff]  ;;  %v1016_v49 = vld [vmem:[%s3986_s9 + $0x50] sm:$0xff]  ;;  %s3718_s14 = scalar_lea.vmem [#allocation2], %s2676_s13  ;;  %s3922_s26 = scalar_lea.hbm %s3988_s11, %s2757_s15 }
  0x1e   : > { %476 = vperm.xlu1 %2834, %v438_v15   ;;  %471 = vperm.xlu0 %2833, %v437_v16   ;;  %v1019_v50 = vld [vmem:[%s3986_s9 + $0x68] sm:$0xff]  ;;  %v1018_v51 = vld [vmem:[%s3986_s9 + $0x60] sm:$0xff]  ;;  %v1021_v52 = vld [vmem:[%s3986_s9 + $0x78] sm:$0xff]  ;;  %s2592_s23 = sshll.u32 %s3718_s14, 4  ;;  %s3931_s20 = scalar_lea.sflag [#allocation3], %s402_s12  ;;  %s3924_s23 = int_to_ptr.vmem [resolvable:$true] %s2592_s23 }
  0x1f   : > { %v422_v13 = vpack.c.bf16 %v419_v10, %v419_v10  ;;  %v517_v17 = vand.u32 %v515_v12, %v421_v11  ;;  %v1020_v53 = vld [vmem:[%s3986_s9 + $0x70] sm:$0xff]  ;;  %v1392_v54 = vld [vmem:[%s3987_s10 + $0x8] sm:$0xff]  ;;  %v1391_v55 = vld [vmem:[%s3987_s10] sm:$0xff]  ;;  %s2888_s28 = scalar_lea.vmem %s3924_s23, 16384  ;;  %s2892_s13 = sshll.u32 %s2970_s16, 4  ;;  %s2893_s13 = int_to_ptr.vmem [resolvable:$false] %s2892_s13 }
  0x20   : > { %v1394_v56 = vld [vmem:[%s3987_s10 + $0x18] sm:$0xff]  ;;  %v1393_v57 = vld [vmem:[%s3987_s10 + $0x10] sm:$0xff]  ;;  %v1396_v58 = vld [vmem:[%s3987_s10 + $0x28] sm:$0xff]  ;;  %p2889_p12 = scmp.ne.s32.totalorder %s3924_s23, %s2888_s28  ;;  %s2894_s15 = scalar_lea.vmem %s2893_s13, 32768 }
  0x21   : > { %v520_v14 = vand.u32 %v515_v12, %v422_v13  ;;  %v1395_v59 = vld [vmem:[%s3987_s10 + $0x20] sm:$0xff]  ;;  %v1398_v60 = vld [vmem:[%s3987_s10 + $0x38] sm:$0xff]  ;;  %v1397_v61 = vld [vmem:[%s3987_s10 + $0x30] sm:$0xff]  ;;  %p2895_p1 = scmp.lt.s32.totalorder %s3924_s23, %s2893_s13  ;;  %p2896_p2 = scmp.lt.s32.totalorder %s2894_s15, %s2888_s28 }
  0x22   : > { %642 = vperm.xlu1 %2834, %v628_v19   ;;  %637 = vperm.xlu0 %2833, %v627_v20   ;;  %v1400_v62 = vld [vmem:[%s3987_s10 + $0x48] sm:$0xff]  ;;  %v1399_v63 = vld [vmem:[%s3987_s10 + $0x40] sm:$0xff]  ;;  %v1402_v0 = vld [vmem:[%s3987_s10 + $0x58] sm:$0xff]  ;;  %p2890_p13 = pnand %p2889_p12, %p3073_p4 }
  0x23   : > { %522 = vmatprep.subr.bf16.mxu0 %v520_v14  ;;  %v1401_v1 = vld [vmem:[%s3987_s10 + $0x50] sm:$0xff]  ;;  %v1404_v3 = vld [vmem:[%s3987_s10 + $0x68] sm:$0xff]  ;;  %v1403_v4 = vld [vmem:[%s3987_s10 + $0x60] sm:$0xff]  ;;  %p2897_p3 = por %p2896_p2, %p2895_p1 }
  0x24   : > { %523 = vmatpush1.bf16.msra.mxu0 %v517_v17  ;;  %v1406_v5 = vld [vmem:[%s3987_s10 + $0x78] sm:$0xff]  ;;  %v1405_v6 = vld [vmem:[%s3987_s10 + $0x70] sm:$0xff]  ;;  %v1408_v7 = vld [vmem:[%s3987_s10 + $0x88] sm:$0xff]  ;;  %p2891_p0 = pneg %p2890_p13 }
  0x25   : > { %v1407_v8 = vld [vmem:[%s3987_s10 + $0x80] sm:$0xff]  ;;  %v1410_v9 = vld [vmem:[%s3987_s10 + $0x98] sm:$0xff]  ;;  %v1409_v10 = vld [vmem:[%s3987_s10 + $0x90] sm:$0xff] }
  0x26   : > { %652 = vperm.xlu1 %2834, %v630_v21   ;;  %647 = vperm.xlu0 %2833, %v629_v22   ;;  %v1412_v11 = vld [vmem:[%s3987_s10 + $0xa8] sm:$0xff]  ;;  %v1411_v12 = vld [vmem:[%s3987_s10 + $0xa0] sm:$0xff]  ;;  %v1414_v13 = vld [vmem:[%s3987_s10 + $0xb8] sm:$0xff]  ;;  %p2898_p5 = pnand %p2897_p3, %p2891_p0 }
  0x27   : > { %2683 = vmatmul.mubr.msk.bf16.vlgmr.msra.gmra.mrb[0].mxu0 %vm499_vm2, %v2836_v18  ;;  %v1413_v14 = vld [vmem:[%s3987_s10 + $0xb0] sm:$0xff]  ;;  %v1416_v15 = vld [vmem:[%s3987_s10 + $0xc8] sm:$0xff]  ;;  %v1415_v16 = vld [vmem:[%s3987_s10 + $0xc0] sm:$0xff] }
  0x28   : > { %564 = vmatprep.mubr.bf16.mxu0 %v2968_v2  ;;  %v1418_v17 = vld [vmem:[%s3987_s10 + $0xd8] sm:$0xff]  ;;  %v1417_v18 = vld [vmem:[%s3987_s10 + $0xd0] sm:$0xff]  ;;  %v1420_v19 = vld [vmem:[%s3987_s10 + $0xe8] sm:$0xff] }
  0x29   : > { %v1419_v20 = vld [vmem:[%s3987_s10 + $0xe0] sm:$0xff]  ;;  %v1422_v21 = vld [vmem:[%s3987_s10 + $0xf8] sm:$0xff]  ;;  %v1421_v22 = vld [vmem:[%s3987_s10 + $0xf0] sm:$0xff] }
  0x2a   : > { %662 = vperm.xlu1 %2834, %v632_v24   ;;  %657 = vperm.xlu0 %2833, %v631_v25   ;;  %v1423_v24 = vld [vmem:[%s3987_s10 + $0x100] sm:$0xff]  ;;  %v1426_v25 = vld [vmem:[%s3987_s10 + $0x118] sm:$0xff] }
  0x2e   : > { %672 = vperm.xlu1 %2834, %v634_v26   ;;  %667 = vperm.xlu0 %2833, %v633_v27   ;;  %v1425_v26 = vld [vmem:[%s3987_s10 + $0x110] sm:$0xff]  ;;  %v1428_v27 = vld [vmem:[%s3987_s10 + $0x128] sm:$0xff] }
  0x2f   : > { %2684 = vmatmul.mubr.msk.bf16.gmra.mrb[4].mxu0 %vm499_vm2, %v2837_v23  ;;  %v1424_v23 = vld [vmem:[%s3987_s10 + $0x108] sm:$0xff] }
  0x30   : > { %574 = vmatprep.mubr.bf16.mxu0 %v2968_v2 }
  0x32   : > { %828 = vperm.xlu1 %2834, %v814_v29   ;;  %823 = vperm.xlu0 %2833, %v813_v30   ;;  %v1430_v29 = vld [vmem:[%s3987_s10 + $0x138] sm:$0xff]  ;;  %v1429_v30 = vld [vmem:[%s3987_s10 + $0x130] sm:$0xff] }
  0x36   : > { %838 = vperm.xlu1 %2834, %v816_v31   ;;  %833 = vperm.xlu0 %2833, %v815_v32   ;;  %v1432_v31 = vld [vmem:[%s3987_s10 + $0x148] sm:$0xff]  ;;  %v1431_v32 = vld [vmem:[%s3987_s10 + $0x140] sm:$0xff] }
  0x37   : > { %2685 = vmatmul.mubr.msk.bf16.gmra.mrb[8].mxu0 %vm499_vm2, %v2838_v28  ;;  %v1427_v28 = vld [vmem:[%s3987_s10 + $0x120] sm:$0xff] }
  0x38   : > { %584 = vmatprep.mubr.bf16.mxu0 %v2968_v2 }
  0x3a   : > { %848 = vperm.xlu1 %2834, %v818_v34   ;;  %843 = vperm.xlu0 %2833, %v817_v35   ;;  %v1433_v34 = vld [vmem:[%s3987_s10 + $0x150] sm:$0xff]  ;;  %v1436_v35 = vld [vmem:[%s3987_s10 + $0x168] sm:$0xff] }
  0x3e   : > { %858 = vperm.xlu1 %2834, %v820_v36   ;;  %853 = vperm.xlu0 %2833, %v819_v37   ;;  %v1435_v36 = vld [vmem:[%s3987_s10 + $0x160] sm:$0xff]  ;;  %v1438_v37 = vld [vmem:[%s3987_s10 + $0x178] sm:$0xff] }
  0x3f   : > { %2686 = vmatmul.mubr.msk.bf16.gmra.mrb[12].mxu0 %vm499_vm2, %v2839_v33  ;;  %v1434_v33 = vld [vmem:[%s3987_s10 + $0x158] sm:$0xff] }
  0x40   : > { %925 = vmatprep.mubr.bf16.mxu0 %v2968_v2 }
  0x42   : > { %1029 = vperm.xlu1 %2834, %v1007_v38   ;;  %1024 = vperm.xlu0 %2833, %v1006_v39   ;;  %v1437_v38 = vld [vmem:[%s3987_s10 + $0x170] sm:$0xff]  ;;  %v1440_v39 = vld [vmem:[%s3987_s10 + $0x188] sm:$0xff] }
  0x46   : > { %1039 = vperm.xlu1 %2834, %v1009_v40   ;;  %1034 = vperm.xlu0 %2833, %v1008_v41   ;;  %v1439_v40 = vld [vmem:[%s3987_s10 + $0x180] sm:$0xff]  ;;  %v1442_v41 = vld [vmem:[%s3987_s10 + $0x198] sm:$0xff] }
  0x4a   : > { %1049 = vperm.xlu1 %2834, %v1011_v42   ;;  %1044 = vperm.xlu0 %2833, %v1010_v43   ;;  %v1441_v42 = vld [vmem:[%s3987_s10 + $0x190] sm:$0xff]  ;;  %v1444_v43 = vld [vmem:[%s3987_s10 + $0x1a8] sm:$0xff] }
  0x4e   : > { %1059 = vperm.xlu1 %2834, %v1013_v44   ;;  %1054 = vperm.xlu0 %2833, %v1012_v45   ;;  %v1443_v44 = vld [vmem:[%s3987_s10 + $0x1a0] sm:$0xff]  ;;  %v1446_v45 = vld [vmem:[%s3987_s10 + $0x1b8] sm:$0xff] }
  0x52   : > { %1069 = vperm.xlu1 %2834, %v1015_v46   ;;  %1064 = vperm.xlu0 %2833, %v1014_v47   ;;  %v1445_v46 = vld [vmem:[%s3987_s10 + $0x1b0] sm:$0xff]  ;;  %v1448_v47 = vld [vmem:[%s3987_s10 + $0x1c8] sm:$0xff] }
  0x56   : > { %1079 = vperm.xlu1 %2834, %v1017_v48   ;;  %1074 = vperm.xlu0 %2833, %v1016_v49   ;;  %v1447_v48 = vld [vmem:[%s3987_s10 + $0x1c0] sm:$0xff] }
  0x5a   : > { %1089 = vperm.xlu1 %2834, %v1019_v50   ;;  %1084 = vperm.xlu0 %2833, %v1018_v51   ;;  %v1450_v51 = vld [vmem:[%s3987_s10 + $0x1d8] sm:$0xff] }
  0x5e   : > { %1099 = vperm.xlu1 %2834, %v1021_v52   ;;  %1094 = vperm.xlu0 %2833, %v1020_v53   ;;  %v1449_v52 = vld [vmem:[%s3987_s10 + $0x1d0] sm:$0xff]  ;;  %v1452_v53 = vld [vmem:[%s3987_s10 + $0x1e8] sm:$0xff] }
  0x62   : > { %1462 = vperm.xlu1 %2834, %v1392_v54   ;;  %1457 = vperm.xlu0 %2833, %v1391_v55   ;;  %v1451_v55 = vld [vmem:[%s3987_s10 + $0x1e0] sm:$0xff] }
  0x66   : > { %1472 = vperm.xlu1 %2834, %v1394_v56   ;;  %1467 = vperm.xlu0 %2833, %v1393_v57   ;;  %v1454_v57 = vld [vmem:[%s3987_s10 + $0x1f8] sm:$0xff] }
  0x6a   : > { %1482 = vperm.xlu1 %2834, %v1396_v58   ;;  %1477 = vperm.xlu0 %2833, %v1395_v59   ;;  %v1453_v58 = vld [vmem:[%s3987_s10 + $0x1f0] sm:$0xff] }
  0x6e   : > { %1492 = vperm.xlu1 %2834, %v1398_v60   ;;  %1487 = vperm.xlu0 %2833, %v1397_v61  }
  0x72   : > { %1502 = vperm.xlu1 %2834, %v1400_v62   ;;  %1497 = vperm.xlu0 %2833, %v1399_v63  }
  0x76   : > { %1512 = vperm.xlu1 %2834, %v1402_v0   ;;  %1507 = vperm.xlu0 %2833, %v1401_v1  }
  0x7a   : > { %1522 = vperm.xlu1 %2834, %v1404_v3   ;;  %1517 = vperm.xlu0 %2833, %v1403_v4  }
  0x7e   : > { %1532 = vperm.xlu1 %2834, %v1406_v5   ;;  %1527 = vperm.xlu0 %2833, %v1405_v6  }
  0x82   : > { %1542 = vperm.xlu1 %2834, %v1408_v7   ;;  %1537 = vperm.xlu0 %2833, %v1407_v8  }
  0x86   : > { %1552 = vperm.xlu1 %2834, %v1410_v9   ;;  %1547 = vperm.xlu0 %2833, %v1409_v10  }
  0x8a   : > { %1562 = vperm.xlu1 %2834, %v1412_v11   ;;  %1557 = vperm.xlu0 %2833, %v1411_v12  }
  0x8e   : > { %1572 = vperm.xlu1 %2834, %v1414_v13   ;;  %1567 = vperm.xlu0 %2833, %v1413_v14  }
  0x91   : > { %v452_v49 = vpop.permute.xlu1 %451  ;;  %v442_v50 = vpop.permute.xlu0 %441 }
  0x92   : > { %1582 = vperm.xlu1 %2834, %v1416_v15   ;;  %1577 = vperm.xlu0 %2833, %v1415_v16  }
  0x95   : > { %v457_v54 = vpop.permute.xlu1 %456  ;;  %v447_v56 = vpop.permute.xlu0 %446 }
  0x96   : > { %1592 = vperm.xlu1 %2834, %v1418_v17   ;;  %1587 = vperm.xlu0 %2833, %v1417_v18  }
  0x99   : > { %v467_v59 = vpop.permute.xlu1 %466  ;;  %v462_v60 = vpop.permute.xlu0 %461 }
  0x9a   : > { %1602 = vperm.xlu1 %2834, %v1420_v19   ;;  %1597 = vperm.xlu0 %2833, %v1419_v20  }
  0x9e   : > { %1612 = vperm.xlu1 %2834, %v1422_v21   ;;  %1607 = vperm.xlu0 %2833, %v1421_v22  }
  0xa2   : > { %1622 = vperm.xlu1 %2834, %v1424_v23   ;;  %1617 = vperm.xlu0 %2833, %v1423_v24  }
  0xa6   : > { %1632 = vperm.xlu1 %2834, %v1426_v25   ;;  %1627 = vperm.xlu0 %2833, %v1425_v26  }
  0xaa   : > { %1642 = vperm.xlu1 %2834, %v1428_v27   ;;  %1637 = vperm.xlu0 %2833, %v1427_v28  }
  0xae   : > { %1652 = vperm.xlu1 %2834, %v1430_v29   ;;  %1647 = vperm.xlu0 %2833, %v1429_v30  }
  0xb2   : > { %1662 = vperm.xlu1 %2834, %v1432_v31   ;;  %1657 = vperm.xlu0 %2833, %v1431_v32  }
  0xb6   : > { %1672 = vperm.xlu1 %2834, %v1434_v33   ;;  %1667 = vperm.xlu0 %2833, %v1433_v34  }
  0xba   : > { %1682 = vperm.xlu1 %2834, %v1436_v35   ;;  %1677 = vperm.xlu0 %2833, %v1435_v36  }
  0xbe   : > { %1692 = vperm.xlu1 %2834, %v1438_v37   ;;  %1687 = vperm.xlu0 %2833, %v1437_v38  }
  0xc2   : > { %1702 = vperm.xlu1 %2834, %v1440_v39   ;;  %1697 = vperm.xlu0 %2833, %v1439_v40   ;;  %v472_v39 = vpop.permute.xlu0 %471 }
  0xc6   : > { %1712 = vperm.xlu1 %2834, %v1442_v41   ;;  %1707 = vperm.xlu0 %2833, %v1441_v42  }
  0xca   : > { %1722 = vperm.xlu1 %2834, %v1444_v43   ;;  %1717 = vperm.xlu0 %2833, %v1443_v44   ;;  %v477_v44 = vpop.permute.xlu1 %476 }
  0xce   : > { %1732 = vperm.xlu1 %2834, %v1446_v45   ;;  %1727 = vperm.xlu0 %2833, %v1445_v46  }
  0xd2   : > { %1742 = vperm.xlu1 %2834, %v1448_v47   ;;  %1737 = vperm.xlu0 %2833, %v1447_v48  }
  0xd6   : > { %1752 = vperm.xlu1 %2834, %v1450_v51   ;;  %1747 = vperm.xlu0 %2833, %v1449_v52  }
  0xda   : > { %1762 = vperm.xlu1 %2834, %v1452_v53   ;;  %1757 = vperm.xlu0 %2833, %v1451_v55  }
  0xde   : > { %1772 = vperm.xlu1 %2834, %v1454_v57   ;;  %1767 = vperm.xlu0 %2833, %v1453_v58   ;;  %v2841_v57 = vld [vmem:[%s3979_s2 + $0x8] sm:$0xff]   ;;  %v2842_v58 = vld [vmem:[%s3979_s2 + $0x10] sm:$0xff]  }
  0xfa   : > { %v556_v61 = vpop.f32.mrb[0].mxu0 }
  0xfb   : > { %v557_v62 = vadd.f32 %v556_v61, %v442_v50  ;;  %v558_v63 = vpop.f32.mrb[1].mxu0 }
  0xfc   : > { %v559_v0 = vadd.f32 %v558_v63, %v442_v50  ;;  %v560_v1 = vpop.f32.mrb[2].mxu0 }
  0xfd   : > { %v561_v3 = vadd.f32 %v560_v1, %v447_v56  ;;  %v562_v4 = vpop.f32.mrb[3].mxu0  ;;  %v595_v6 = vmax.f32 %v557_v62, 0.0 }
  0xfe   : > { %v563_v5 = vadd.f32 %v562_v4, %v447_v56  ;;  %v596_v8 = vmax.f32 %v559_v0, 0.0  ;;  %v2840_v56 = vld [vmem:[%s3979_s2] sm:$0xff]   ;;  %v643_v0 = vpop.permute.xlu1 %642 }
  0xff   : > { %v597_v7 = vmax.f32 %v561_v3, 0.0 }
 0x100   : > { %v598_v9 = vmax.f32 %v563_v5, 0.0 }
 0x101   : > { %v611_v10 = vpack.c.bf16 %v597_v7, %v595_v6 }
 0x102   : > { %v566_v11 = vpop.f32.mrb[4].mxu0  ;;  %v612_v12 = vpack.c.bf16 %v598_v9, %v596_v8 }
 0x103   : > { %v567_v13 = vadd.f32 %v566_v11, %v452_v49  ;;  %v568_v14 = vpop.f32.mrb[5].mxu0 }
 0x104   : > { %v569_v15 = vadd.f32 %v568_v14, %v452_v49  ;;  %v570_v16 = vpop.f32.mrb[6].mxu0  ;;  %708 = vmatprep.subr.bf16.mxu1 %v612_v12 }
 0x105   : > { %v571_v17 = vadd.f32 %v570_v16, %v457_v54  ;;  %v572_v18 = vpop.f32.mrb[7].mxu0  ;;  %709 = vmatpush1.bf16.msra.mxu1 %v611_v10  ;;  %v599_v20 = vmax.f32 %v567_v13, 0.0 }
 0x106   : > { %v573_v19 = vadd.f32 %v572_v18, %v457_v54  ;;  %v600_v22 = vmax.f32 %v569_v15, 0.0 }
 0x107   : > { %v601_v21 = vmax.f32 %v571_v17, 0.0  ;;  %v653_v17 = vpop.permute.xlu1 %652 }
 0x108   : > { %v602_v23 = vmax.f32 %v573_v19, 0.0 }
 0x109   : > { %v613_v24 = vpack.c.bf16 %v601_v21, %v599_v20 }
 0x10a   : > { %v614_v25 = vpack.c.bf16 %v602_v23, %v600_v22  ;;  %v576_v26 = vpop.f32.mrb[8].mxu0 }
 0x10b   : > { %v577_v27 = vadd.f32 %v576_v26, %v462_v60  ;;  %v578_v28 = vpop.f32.mrb[9].mxu0 }
 0x10c   : > { %v579_v29 = vadd.f32 %v578_v28, %v462_v60  ;;  %v580_v30 = vpop.f32.mrb[10].mxu0  ;;  %710 = vmatprep.subr.bf16.mxu1 %v614_v25  ;;  %v638_v60 = vpop.permute.xlu0 %637 }
 0x10d   : > { %v581_v31 = vadd.f32 %v580_v30, %v467_v59  ;;  %v582_v32 = vpop.f32.mrb[11].mxu0  ;;  %711 = vmatpush1.bf16.msra.mxu1 %v613_v24  ;;  %v603_v34 = vmax.f32 %v577_v27, 0.0 }
 0x10e   : > { %v583_v33 = vadd.f32 %v582_v32, %v467_v59  ;;  %v604_v36 = vmax.f32 %v579_v29, 0.0  ;;  %v2843_v59 = vld [vmem:[%s3979_s2 + $0x18] sm:$0xff]  }
 0x10f   : > { %v605_v35 = vmax.f32 %v581_v31, 0.0 }
 0x110   : > { %v606_v37 = vmax.f32 %v583_v33, 0.0  ;;  %v648_v12 = vpop.permute.xlu0 %647  ;;  %v663_v33 = vpop.permute.xlu1 %662 }
 0x111   : > { %v615_v38 = vpack.c.bf16 %v605_v35, %v603_v34 }
 0x112   : > { %v616_v40 = vpack.c.bf16 %v606_v37, %v604_v36  ;;  %v586_v41 = vpop.f32.mrb[12].mxu0 }
 0x113   : > { %v587_v42 = vadd.f32 %v586_v41, %v472_v39  ;;  %v588_v43 = vpop.f32.mrb[13].mxu0 }
 0x114   : > { %v589_v45 = vadd.f32 %v588_v43, %v472_v39  ;;  %v590_v46 = vpop.f32.mrb[14].mxu0  ;;  %712 = vmatprep.subr.bf16.mxu1 %v616_v40  ;;  %v658_v28 = vpop.permute.xlu0 %657 }
 0x115   : > { %v591_v47 = vadd.f32 %v590_v46, %v477_v44  ;;  %v592_v48 = vpop.f32.mrb[15].mxu0  ;;  %713 = vmatpush1.bf16.msra.mxu1 %v615_v38  ;;  %v607_v50 = vmax.f32 %v587_v42, 0.0 }
 0x116   : > { %v593_v49 = vadd.f32 %v592_v48, %v477_v44  ;;  %v608_v52 = vmax.f32 %v589_v45, 0.0 }
 0x117   : > { %v609_v51 = vmax.f32 %v591_v47, 0.0 }
 0x118   : > { %v610_v53 = vmax.f32 %v593_v49, 0.0  ;;  %v668_v44 = vpop.permute.xlu0 %667  ;;  %v673_v49 = vpop.permute.xlu1 %672 }
 0x119   : > { %v617_v54 = vpack.c.bf16 %v609_v51, %v607_v50 }
 0x11a   : > { %v618_v55 = vpack.c.bf16 %v610_v53, %v608_v52 }
 0x11c   : > { %714 = vmatprep.subr.bf16.mxu1 %v618_v55 }
 0x11d   : > { %715 = vmatpush1.bf16.msra.mxu1 %v617_v54 }
 0x120   : > { %2691 = vmatmul.mubr.msk.bf16.vlgmr.msra.gmra.mrb[0].mxu1 %vm695_vm3, %v2840_v56 }
 0x121   : > { %750 = vmatprep.mubr.bf16.mxu1 %v2968_v2 }
 0x128   : > { %2692 = vmatmul.mubr.msk.bf16.gmra.mrb[4].mxu1 %vm695_vm3, %v2841_v57 }
 0x129   : > { %760 = vmatprep.mubr.bf16.mxu1 %v2968_v2 }
 0x130   : > { %2693 = vmatmul.mubr.msk.bf16.gmra.mrb[8].mxu1 %vm695_vm3, %v2842_v58 }
 0x131   : > { %770 = vmatprep.mubr.bf16.mxu1 %v2968_v2 }
 0x138   : > { %2694 = vmatmul.mubr.msk.bf16.gmra.mrb[12].mxu1 %vm695_vm3, %v2843_v59 }
 0x139   : > { %1198 = vmatprep.mubr.bf16.mxu1 %v2968_v2 }
 0x1f3   : > { %v742_v61 = vpop.f32.mrb[0].mxu1 }
 0x1f4   : > { %v743_v62 = vadd.f32 %v742_v61, %v638_v60  ;;  %v744_v63 = vpop.f32.mrb[1].mxu1  ;;  %v2844_v61 = vld [vmem:[%s3980_s3] sm:$0xff]  }
 0x1f5   : > { %v745_v1 = vadd.f32 %v744_v63, %v638_v60  ;;  %v746_v3 = vpop.f32.mrb[2].mxu1  ;;  %v2846_v63 = vld [vmem:[%s3980_s3 + $0x10] sm:$0xff]  }
 0x1f6   : > { %v747_v4 = vadd.f32 %v746_v3, %v643_v0  ;;  %v748_v5 = vpop.f32.mrb[3].mxu1  ;;  %v781_v7 = vmax.f32 %v743_v62, 0.0  ;;  %v2845_v62 = vld [vmem:[%s3980_s3 + $0x8] sm:$0xff]  }
 0x1f7   : > { %v749_v6 = vadd.f32 %v748_v5, %v643_v0  ;;  %v782_v9 = vmax.f32 %v745_v1, 0.0  ;;  %v2847_v0 = vld [vmem:[%s3980_s3 + $0x18] sm:$0xff]   ;;  %v824_v1 = vpop.permute.xlu0 %823 }
 0x1f8   : > { %v783_v8 = vmax.f32 %v747_v4, 0.0 }
 0x1f9   : > { %v784_v10 = vmax.f32 %v749_v6, 0.0  ;;  %v829_v6 = vpop.permute.xlu1 %828 }
 0x1fa   : > { %v797_v11 = vpack.c.bf16 %v783_v8, %v781_v7 }
 0x1fb   : > { %v798_v13 = vpack.c.bf16 %v784_v10, %v782_v9  ;;  %v752_v14 = vpop.f32.mrb[4].mxu1 }
 0x1fc   : > { %v753_v15 = vadd.f32 %v752_v14, %v648_v12  ;;  %v754_v16 = vpop.f32.mrb[5].mxu1 }
 0x1fd   : > { %v755_v18 = vadd.f32 %v754_v16, %v648_v12  ;;  %v756_v19 = vpop.f32.mrb[6].mxu1  ;;  %893 = vmatprep.subr.bf16.mxu0 %v798_v13 }
 0x1fe   : > { %v757_v20 = vadd.f32 %v756_v19, %v653_v17  ;;  %v758_v21 = vpop.f32.mrb[7].mxu1  ;;  %894 = vmatpush1.bf16.msra.mxu0 %v797_v11  ;;  %v785_v23 = vmax.f32 %v753_v15, 0.0 }
 0x1ff   : > { %v759_v22 = vadd.f32 %v758_v21, %v653_v17  ;;  %v786_v25 = vmax.f32 %v755_v18, 0.0  ;;  %v834_v17 = vpop.permute.xlu0 %833 }
 0x200   : > { %v787_v24 = vmax.f32 %v757_v20, 0.0 }
 0x201   : > { %v788_v26 = vmax.f32 %v759_v22, 0.0  ;;  %v839_v22 = vpop.permute.xlu1 %838 }
 0x202   : > { %v799_v27 = vpack.c.bf16 %v787_v24, %v785_v23 }
 0x203   : > { %v800_v29 = vpack.c.bf16 %v788_v26, %v786_v25  ;;  %v762_v30 = vpop.f32.mrb[8].mxu1 }
 0x204   : > { %v763_v31 = vadd.f32 %v762_v30, %v658_v28  ;;  %v764_v32 = vpop.f32.mrb[9].mxu1 }
 0x205   : > { %v765_v34 = vadd.f32 %v764_v32, %v658_v28  ;;  %v766_v35 = vpop.f32.mrb[10].mxu1  ;;  %895 = vmatprep.subr.bf16.mxu0 %v800_v29 }
 0x206   : > { %v767_v36 = vadd.f32 %v766_v35, %v663_v33  ;;  %v768_v37 = vpop.f32.mrb[11].mxu1  ;;  %896 = vmatpush1.bf16.msra.mxu0 %v799_v27  ;;  %v789_v39 = vmax.f32 %v763_v31, 0.0 }
 0x207   : > { %v769_v38 = vadd.f32 %v768_v37, %v663_v33  ;;  %v790_v41 = vmax.f32 %v765_v34, 0.0  ;;  %v844_v33 = vpop.permute.xlu0 %843 }
 0x208   : > { %v791_v40 = vmax.f32 %v767_v36, 0.0 }
 0x209   : > { %v792_v42 = vmax.f32 %v769_v38, 0.0  ;;  %v849_v38 = vpop.permute.xlu1 %848 }
 0x20a   : > { %v801_v43 = vpack.c.bf16 %v791_v40, %v789_v39 }
 0x20b   : > { %v802_v45 = vpack.c.bf16 %v792_v42, %v790_v41  ;;  %v772_v46 = vpop.f32.mrb[12].mxu1 }
 0x20c   : > { %v773_v47 = vadd.f32 %v772_v46, %v668_v44  ;;  %v774_v48 = vpop.f32.mrb[13].mxu1 }
 0x20d   : > { %v775_v50 = vadd.f32 %v774_v48, %v668_v44  ;;  %v776_v51 = vpop.f32.mrb[14].mxu1  ;;  %897 = vmatprep.subr.bf16.mxu0 %v802_v45 }
 0x20e   : > { %v777_v52 = vadd.f32 %v776_v51, %v673_v49  ;;  %v778_v53 = vpop.f32.mrb[15].mxu1  ;;  %898 = vmatpush1.bf16.msra.mxu0 %v801_v43  ;;  %v793_v55 = vmax.f32 %v773_v47, 0.0 }
 0x20f   : > { %v779_v54 = vadd.f32 %v778_v53, %v673_v49  ;;  %v794_v57 = vmax.f32 %v775_v50, 0.0  ;;  %v854_v49 = vpop.permute.xlu0 %853 }
 0x210   : > { %v795_v56 = vmax.f32 %v777_v52, 0.0 }
 0x211   : > { %v796_v58 = vmax.f32 %v779_v54, 0.0  ;;  %v859_v54 = vpop.permute.xlu1 %858 }
 0x212   : > { %v803_v59 = vpack.c.bf16 %v795_v56, %v793_v55 }
 0x213   : > { %v804_v60 = vpack.c.bf16 %v796_v58, %v794_v57 }
 0x215   : > { %899 = vmatprep.subr.bf16.mxu0 %v804_v60 }
 0x216   : > { %900 = vmatpush1.bf16.msra.mxu0 %v803_v59 }
 0x219   : > { %2699 = vmatmul.mubr.msk.bf16.vlgmr.msra.gmra.mrb[16].mxu0 %vm695_vm3, %v2844_v61 }
 0x21a   : > { %935 = vmatprep.mubr.bf16.mxu0 %v2968_v2 }
 0x221   : > { %2700 = vmatmul.mubr.msk.bf16.gmra.mrb[20].mxu0 %vm695_vm3, %v2845_v62 }
 0x222   : > { %945 = vmatprep.mubr.bf16.mxu0 %v2968_v2 }
 0x229   : > { %2701 = vmatmul.mubr.msk.bf16.gmra.mrb[24].mxu0 %vm695_vm3, %v2846_v63 }
 0x22a   : > { %955 = vmatprep.mubr.bf16.mxu0 %v2968_v2 }
 0x231   : > { %2702 = vmatmul.mubr.msk.bf16.gmra.mrb[28].mxu0 %vm695_vm3, %v2847_v0 }
 0x232   : > { %1999 = vmatprep.mubr.bf16.mxu0 %v2968_v2 }
 0x2ec   : > { %v927_v3 = vpop.f32.mrb[16].mxu0 }
 0x2ed   : > { %v928_v4 = vadd.f32 %v927_v3, %v824_v1  ;;  %v929_v5 = vpop.f32.mrb[17].mxu0  ;;  %v2848_v3 = vld [vmem:[%s3981_s4] sm:$0xff]  }
 0x2ee   : > { %v930_v7 = vadd.f32 %v929_v5, %v824_v1  ;;  %v931_v8 = vpop.f32.mrb[18].mxu0  ;;  %v2850_v5 = vld [vmem:[%s3981_s4 + $0x10] sm:$0xff]  }
 0x2ef   : > { %v932_v9 = vadd.f32 %v931_v8, %v829_v6  ;;  %v933_v10 = vpop.f32.mrb[19].mxu0  ;;  %v966_v12 = vmax.f32 %v928_v4, 0.0  ;;  %v2849_v4 = vld [vmem:[%s3981_s4 + $0x8] sm:$0xff]  }
 0x2f0   : > { %v934_v11 = vadd.f32 %v933_v10, %v829_v6  ;;  %v967_v14 = vmax.f32 %v930_v7, 0.0  ;;  %v2851_v6 = vld [vmem:[%s3981_s4 + $0x18] sm:$0xff]   ;;  %v2852_v7 = vld [vmem:[%s3981_s4 + $0x20] sm:$0xff]   ;;  %v2853_v8 = vld [vmem:[%s3981_s4 + $0x28] sm:$0xff]  }
 0x2f1   : > { %v968_v13 = vmax.f32 %v932_v9, 0.0  ;;  %v2854_v9 = vld [vmem:[%s3981_s4 + $0x30] sm:$0xff]   ;;  %v2855_v10 = vld [vmem:[%s3981_s4 + $0x38] sm:$0xff]  }
 0x2f2   : > { %v969_v15 = vmax.f32 %v934_v11, 0.0  ;;  %v1025_v11 = vpop.permute.xlu0 %1024 }
 0x2f3   : > { %v982_v16 = vpack.c.bf16 %v968_v13, %v966_v12 }
 0x2f4   : > { %v983_v18 = vpack.c.bf16 %v969_v15, %v967_v14  ;;  %v937_v19 = vpop.f32.mrb[20].mxu0  ;;  %v1030_v15 = vpop.permute.xlu1 %1029 }
 0x2f5   : > { %v938_v20 = vadd.f32 %v937_v19, %v834_v17  ;;  %v939_v21 = vpop.f32.mrb[21].mxu0 }
 0x2f6   : > { %v940_v23 = vadd.f32 %v939_v21, %v834_v17  ;;  %v941_v24 = vpop.f32.mrb[22].mxu0  ;;  %1166 = vmatprep.subr.bf16.mxu1 %v983_v18 }
 0x2f7   : > { %v942_v25 = vadd.f32 %v941_v24, %v839_v22  ;;  %v943_v26 = vpop.f32.mrb[23].mxu0  ;;  %1167 = vmatpush1.bf16.msra.mxu1 %v982_v16  ;;  %v970_v28 = vmax.f32 %v938_v20, 0.0 }
 0x2f8   : > { %v944_v27 = vadd.f32 %v943_v26, %v839_v22  ;;  %v971_v30 = vmax.f32 %v940_v23, 0.0  ;;  %v1035_v26 = vpop.permute.xlu0 %1034 }
 0x2f9   : > { %v972_v29 = vmax.f32 %v942_v25, 0.0 }
 0x2fa   : > { %v973_v31 = vmax.f32 %v944_v27, 0.0 }
 0x2fb   : > { %v984_v32 = vpack.c.bf16 %v972_v29, %v970_v28 }
 0x2fc   : > { %v985_v34 = vpack.c.bf16 %v973_v31, %v971_v30  ;;  %v947_v35 = vpop.f32.mrb[24].mxu0  ;;  %v1040_v31 = vpop.permute.xlu1 %1039 }
 0x2fd   : > { %v948_v36 = vadd.f32 %v947_v35, %v844_v33  ;;  %v949_v37 = vpop.f32.mrb[25].mxu0 }
 0x2fe   : > { %v950_v39 = vadd.f32 %v949_v37, %v844_v33  ;;  %v951_v40 = vpop.f32.mrb[26].mxu0  ;;  %1168 = vmatprep.subr.bf16.mxu1 %v985_v34 }
 0x2ff   : > { %v952_v41 = vadd.f32 %v951_v40, %v849_v38  ;;  %v953_v42 = vpop.f32.mrb[27].mxu0  ;;  %1169 = vmatpush1.bf16.msra.mxu1 %v984_v32  ;;  %v974_v44 = vmax.f32 %v948_v36, 0.0 }
 0x300   : > { %v954_v43 = vadd.f32 %v953_v42, %v849_v38  ;;  %v975_v46 = vmax.f32 %v950_v39, 0.0  ;;  %v1045_v42 = vpop.permute.xlu0 %1044 }
 0x301   : > { %v976_v45 = vmax.f32 %v952_v41, 0.0 }
 0x302   : > { %v977_v47 = vmax.f32 %v954_v43, 0.0 }
 0x303   : > { %v986_v48 = vpack.c.bf16 %v976_v45, %v974_v44 }
 0x304   : > { %v987_v50 = vpack.c.bf16 %v977_v47, %v975_v46  ;;  %v957_v51 = vpop.f32.mrb[28].mxu0  ;;  %v1050_v47 = vpop.permute.xlu1 %1049 }
 0x305   : > { %v958_v52 = vadd.f32 %v957_v51, %v854_v49  ;;  %v959_v53 = vpop.f32.mrb[29].mxu0 }
 0x306   : > { %v960_v55 = vadd.f32 %v959_v53, %v854_v49  ;;  %v961_v56 = vpop.f32.mrb[30].mxu0  ;;  %1170 = vmatprep.subr.bf16.mxu1 %v987_v50 }
 0x307   : > { %v962_v57 = vadd.f32 %v961_v56, %v859_v54  ;;  %v963_v58 = vpop.f32.mrb[31].mxu0  ;;  %1171 = vmatpush1.bf16.msra.mxu1 %v986_v48  ;;  %v978_v60 = vmax.f32 %v958_v52, 0.0 }
 0x308   : > { %v964_v59 = vadd.f32 %v963_v58, %v859_v54  ;;  %v979_v62 = vmax.f32 %v960_v55, 0.0  ;;  %v1055_v58 = vpop.permute.xlu0 %1054 }
 0x309   : > { %v980_v61 = vmax.f32 %v962_v57, 0.0 }
 0x30a   : > { %v981_v63 = vmax.f32 %v964_v59, 0.0 }
 0x30b   : > { %v988_v0 = vpack.c.bf16 %v980_v61, %v978_v60 }
 0x30c   : > { %v989_v1 = vpack.c.bf16 %v981_v63, %v979_v62  ;;  %v1060_v63 = vpop.permute.xlu1 %1059 }
 0x30e   : > { %1172 = vmatprep.subr.bf16.mxu1 %v989_v1 }
 0x30f   : > { %1173 = vmatpush1.bf16.msra.mxu1 %v988_v0 }
 0x312   : > { %2711 = vmatmul.mubr.msk.bf16.vlgmr.msra.gmra.mrb[16].mxu1 %vm695_vm3, %v2848_v3 }
 0x313   : > { %1208 = vmatprep.mubr.bf16.mxu1 %v2968_v2 }
 0x31a   : > { %2712 = vmatmul.mubr.msk.bf16.gmra.mrb[20].mxu1 %vm695_vm3, %v2849_v4 }
 0x31b   : > { %1218 = vmatprep.mubr.bf16.mxu1 %v2968_v2 }
 0x322   : > { %2713 = vmatmul.mubr.msk.bf16.gmra.mrb[24].mxu1 %vm695_vm3, %v2850_v5 }
 0x323   : > { %1228 = vmatprep.mubr.bf16.mxu1 %v2968_v2 }
 0x32a   : > { %2714 = vmatmul.mubr.msk.bf16.gmra.mrb[28].mxu1 %vm695_vm3, %v2851_v6 }
 0x32b   : > { %1238 = vmatprep.mubr.bf16.mxu1 %v2968_v2 }
 0x332   : > { %2715 = vmatmul.mubr.msk.bf16.gmra.mrb[32].mxu1 %vm695_vm3, %v2852_v7 }
 0x333   : > { %1248 = vmatprep.mubr.bf16.mxu1 %v2968_v2 }
 0x33a   : > { %2716 = vmatmul.mubr.msk.bf16.gmra.mrb[36].mxu1 %vm695_vm3, %v2853_v8 }
 0x33b   : > { %1258 = vmatprep.mubr.bf16.mxu1 %v2968_v2 }
 0x342   : > { %2717 = vmatmul.mubr.msk.bf16.gmra.mrb[40].mxu1 %vm695_vm3, %v2854_v9 }
 0x343   : > { %1268 = vmatprep.mubr.bf16.mxu1 %v2968_v2 }
 0x34a   : > { %2718 = vmatmul.mubr.msk.bf16.gmra.mrb[44].mxu1 %vm695_vm3, %v2855_v10 }
 0x34b   : > { %2189 = vmatprep.mubr.bf16.mxu1 %v2968_v2 }
 0x3e5   : > { %v1200_v12 = vpop.f32.mrb[16].mxu1 }
 0x3e6   : > { %v1201_v13 = vadd.f32 %v1200_v12, %v1025_v11  ;;  %v1202_v14 = vpop.f32.mrb[17].mxu1 }
 0x3e7   : > { %v1203_v16 = vadd.f32 %v1202_v14, %v1025_v11  ;;  %v1204_v17 = vpop.f32.mrb[18].mxu1  ;;  %v1065_v11 = vpop.permute.xlu0 %1064 }
 0x3e8   : > { %v1205_v18 = vadd.f32 %v1204_v17, %v1030_v15  ;;  %v1206_v19 = vpop.f32.mrb[19].mxu1  ;;  %v1279_v21 = vmax.f32 %v1201_v13, 0.0 }
 0x3e9   : > { %v1207_v20 = vadd.f32 %v1206_v19, %v1030_v15  ;;  %v1280_v23 = vmax.f32 %v1203_v16, 0.0  ;;  %v1070_v16 = vpop.permute.xlu1 %1069 }
 0x3ea   : > { %v1281_v22 = vmax.f32 %v1205_v18, 0.0 }
 0x3eb   : > { %v1282_v24 = vmax.f32 %v1207_v20, 0.0 }
 0x3ec   : > { %v1311_v25 = vpack.c.bf16 %v1281_v22, %v1279_v21 }
 0x3ed   : > { %v1312_v27 = vpack.c.bf16 %v1282_v24, %v1280_v23  ;;  %v1210_v28 = vpop.f32.mrb[20].mxu1 }
 0x3ee   : > { %v1211_v29 = vadd.f32 %v1210_v28, %v1035_v26  ;;  %v1212_v30 = vpop.f32.mrb[21].mxu1 }
 0x3ef   : > { %v1213_v32 = vadd.f32 %v1212_v30, %v1035_v26  ;;  %v1214_v33 = vpop.f32.mrb[22].mxu1  ;;  %1967 = vmatprep.subr.bf16.mxu0 %v1312_v27  ;;  %2758 = vmatprep.subr.bf16.mxu1 %v1312_v27  ;;  %v1075_v27 = vpop.permute.xlu0 %1074 }
 0x3f0   : > { %v1215_v34 = vadd.f32 %v1214_v33, %v1040_v31  ;;  %v1216_v35 = vpop.f32.mrb[23].mxu1  ;;  %1968 = vmatpush1.bf16.msra.mxu0 %v1311_v25  ;;  %2766 = vmatpush1.bf16.msra.mxu1 %v1311_v25  ;;  %v1283_v37 = vmax.f32 %v1211_v29, 0.0 }
 0x3f1   : > { %v1217_v36 = vadd.f32 %v1216_v35, %v1040_v31  ;;  %v1284_v39 = vmax.f32 %v1213_v32, 0.0  ;;  %v1080_v32 = vpop.permute.xlu1 %1079 }
 0x3f2   : > { %v1285_v38 = vmax.f32 %v1215_v34, 0.0 }
 0x3f3   : > { %v1286_v40 = vmax.f32 %v1217_v36, 0.0 }
 0x3f4   : > { %v1313_v41 = vpack.c.bf16 %v1285_v38, %v1283_v37 }
 0x3f5   : > { %v1314_v43 = vpack.c.bf16 %v1286_v40, %v1284_v39  ;;  %v1220_v44 = vpop.f32.mrb[24].mxu1 }
 0x3f6   : > { %v1221_v45 = vadd.f32 %v1220_v44, %v1045_v42  ;;  %v1222_v46 = vpop.f32.mrb[25].mxu1 }
 0x3f7   : > { %v1223_v48 = vadd.f32 %v1222_v46, %v1045_v42  ;;  %v1224_v49 = vpop.f32.mrb[26].mxu1  ;;  %1969 = vmatprep.subr.bf16.mxu0 %v1314_v43  ;;  %2759 = vmatprep.subr.bf16.mxu1 %v1314_v43  ;;  %v1085_v43 = vpop.permute.xlu0 %1084 }
 0x3f8   : > { %v1225_v50 = vadd.f32 %v1224_v49, %v1050_v47  ;;  %v1226_v51 = vpop.f32.mrb[27].mxu1  ;;  %1970 = vmatpush1.bf16.msra.mxu0 %v1313_v41  ;;  %2767 = vmatpush1.bf16.msra.mxu1 %v1313_v41  ;;  %v1287_v53 = vmax.f32 %v1221_v45, 0.0 }
 0x3f9   : > { %v1227_v52 = vadd.f32 %v1226_v51, %v1050_v47  ;;  %v1288_v55 = vmax.f32 %v1223_v48, 0.0  ;;  %v1090_v48 = vpop.permute.xlu1 %1089 }
 0x3fa   : > { %v1289_v54 = vmax.f32 %v1225_v50, 0.0 }
 0x3fb   : > { %v1290_v56 = vmax.f32 %v1227_v52, 0.0 }
 0x3fc   : > { %v1315_v57 = vpack.c.bf16 %v1289_v54, %v1287_v53 }
 0x3fd   : > { %v1316_v59 = vpack.c.bf16 %v1290_v56, %v1288_v55  ;;  %v1230_v60 = vpop.f32.mrb[28].mxu1 }
 0x3fe   : > { %v1231_v61 = vadd.f32 %v1230_v60, %v1055_v58  ;;  %v1232_v62 = vpop.f32.mrb[29].mxu1 }
 0x3ff   : > { %v1233_v0 = vadd.f32 %v1232_v62, %v1055_v58  ;;  %v1234_v1 = vpop.f32.mrb[30].mxu1  ;;  %1971 = vmatprep.subr.bf16.mxu0 %v1316_v59  ;;  %2760 = vmatprep.subr.bf16.mxu1 %v1316_v59  ;;  %v1095_v59 = vpop.permute.xlu0 %1094 }
 0x400   : > { %v1235_v3 = vadd.f32 %v1234_v1, %v1060_v63  ;;  %v1236_v4 = vpop.f32.mrb[31].mxu1  ;;  %1972 = vmatpush1.bf16.msra.mxu0 %v1315_v57  ;;  %2768 = vmatpush1.bf16.msra.mxu1 %v1315_v57  ;;  %v1291_v6 = vmax.f32 %v1231_v61, 0.0 }
 0x401   : > { %v1237_v5 = vadd.f32 %v1236_v4, %v1060_v63  ;;  %v1292_v8 = vmax.f32 %v1233_v0, 0.0  ;;  %v1100_v0 = vpop.permute.xlu1 %1099 }
 0x402   : > { %v1293_v7 = vmax.f32 %v1235_v3, 0.0 }
 0x403   : > { %v1294_v9 = vmax.f32 %v1237_v5, 0.0 }
 0x404   : > { %v1317_v10 = vpack.c.bf16 %v1293_v7, %v1291_v6 }
 0x405   : > { %v1318_v12 = vpack.c.bf16 %v1294_v9, %v1292_v8  ;;  %v1240_v13 = vpop.f32.mrb[32].mxu1 }
 0x406   : > { %v1241_v14 = vadd.f32 %v1240_v13, %v1065_v11  ;;  %v1242_v15 = vpop.f32.mrb[33].mxu1  ;;  %v2856_v13 = vld [vmem:[%s3982_s5] sm:$0xff]  }
 0x407   : > { %v1243_v17 = vadd.f32 %v1242_v15, %v1065_v11  ;;  %v1244_v18 = vpop.f32.mrb[34].mxu1  ;;  %1973 = vmatprep.subr.bf16.mxu0 %v1318_v12  ;;  %2761 = vmatprep.subr.bf16.mxu1 %v1318_v12  ;;  %v2858_v15 = vld [vmem:[%s3982_s5 + $0x8] sm:$0xff]  }
 0x408   : > { %v1245_v19 = vadd.f32 %v1244_v18, %v1070_v16  ;;  %v1246_v20 = vpop.f32.mrb[35].mxu1  ;;  %1974 = vmatpush1.bf16.msra.mxu0 %v1317_v10  ;;  %2769 = vmatpush1.bf16.msra.mxu1 %v1317_v10  ;;  %v1295_v22 = vmax.f32 %v1241_v14, 0.0  ;;  %v2857_v14 = vld [vmem:[%s3982_s5 + $0x98] sm:$0xff]   ;;  %v2861_v18 = vld [vmem:[%s3982_s5 + $0xa8] sm:$0xff]  }
 0x409   : > { %v1247_v21 = vadd.f32 %v1246_v20, %v1070_v16  ;;  %v1296_v24 = vmax.f32 %v1243_v17, 0.0  ;;  %v2859_v16 = vld [vmem:[%s3982_s5 + $0xa0] sm:$0xff]   ;;  %v2860_v17 = vld [vmem:[%s3982_s5 + $0x10] sm:$0xff]  }
 0x40a   : > { %v1297_v23 = vmax.f32 %v1245_v19, 0.0  ;;  %v2862_v19 = vld [vmem:[%s3982_s5 + $0x18] sm:$0xff]   ;;  %v2863_v20 = vld [vmem:[%s3982_s5 + $0xb0] sm:$0xff]  }
 0x40b   : > { %v1298_v25 = vmax.f32 %v1247_v21, 0.0  ;;  %v2864_v21 = vld [vmem:[%s3982_s5 + $0x20] sm:$0xff]  }
 0x40c   : > { %v1319_v26 = vpack.c.bf16 %v1297_v23, %v1295_v22  ;;  %v2865_v22 = vld [vmem:[%s3982_s5 + $0xb8] sm:$0xff]   ;;  %v2866_v23 = vld [vmem:[%s3982_s5 + $0x28] sm:$0xff]  }
 0x40d   : > { %v1320_v28 = vpack.c.bf16 %v1298_v25, %v1296_v24  ;;  %v1250_v29 = vpop.f32.mrb[36].mxu1  ;;  %v2867_v24 = vld [vmem:[%s3982_s5 + $0xc0] sm:$0xff]   ;;  %v2868_v25 = vld [vmem:[%s3982_s5 + $0x30] sm:$0xff]  }
 0x40e   : > { %v1251_v30 = vadd.f32 %v1250_v29, %v1075_v27  ;;  %v1252_v31 = vpop.f32.mrb[37].mxu1  ;;  %v2872_v29 = vld [vmem:[%s3982_s5 + $0x40] sm:$0xff]  }
 0x40f   : > { %v1253_v33 = vadd.f32 %v1252_v31, %v1075_v27  ;;  %v1254_v34 = vpop.f32.mrb[38].mxu1  ;;  %1975 = vmatprep.subr.bf16.mxu0 %v1320_v28  ;;  %2762 = vmatprep.subr.bf16.mxu1 %v1320_v28  ;;  %v2870_v27 = vld [vmem:[%s3982_s5 + $0x38] sm:$0xff]   ;;  %v2871_v28 = vld [vmem:[%s3982_s5 + $0xd0] sm:$0xff]   ;;  %v2874_v31 = vld [vmem:[%s3982_s5 + $0x48] sm:$0xff]  }
 0x410   : > { %v1255_v35 = vadd.f32 %v1254_v34, %v1080_v32  ;;  %v1256_v36 = vpop.f32.mrb[39].mxu1  ;;  %1976 = vmatpush1.bf16.msra.mxu0 %v1319_v26  ;;  %2770 = vmatpush1.bf16.msra.mxu1 %v1319_v26  ;;  %v1299_v38 = vmax.f32 %v1251_v30, 0.0  ;;  %v2869_v26 = vld [vmem:[%s3982_s5 + $0xc8] sm:$0xff]   ;;  %v2873_v30 = vld [vmem:[%s3982_s5 + $0xd8] sm:$0xff]  }
 0x411   : > { %v1257_v37 = vadd.f32 %v1256_v36, %v1080_v32  ;;  %v1300_v40 = vmax.f32 %v1253_v33, 0.0  ;;  %v2875_v32 = vld [vmem:[%s3982_s5 + $0xe0] sm:$0xff]   ;;  %v2876_v33 = vld [vmem:[%s3982_s5 + $0x50] sm:$0xff]   ;;  %v2877_v34 = vld [vmem:[%s3982_s5 + $0xe8] sm:$0xff]  }
 0x412   : > { %v1301_v39 = vmax.f32 %v1255_v35, 0.0  ;;  %v2878_v35 = vld [vmem:[%s3982_s5 + $0x58] sm:$0xff]   ;;  %v2879_v36 = vld [vmem:[%s3982_s5 + $0xf0] sm:$0xff]  }
 0x413   : > { %v1302_v41 = vmax.f32 %v1257_v37, 0.0  ;;  %v2880_v37 = vld [vmem:[%s3982_s5 + $0x60] sm:$0xff]  }
 0x414   : > { %v1321_v42 = vpack.c.bf16 %v1301_v39, %v1299_v38  ;;  %v2881_v38 = vld [vmem:[%s3982_s5 + $0xf8] sm:$0xff]   ;;  %v3611_v39 = vpop.permute.xlu1 %1462 }
 0x415   : > { %v1322_v44 = vpack.c.bf16 %v1302_v41, %v1300_v40  ;;  %v1260_v45 = vpop.f32.mrb[40].mxu1  ;;  %v3613_v40 = vpop.permute.xlu0 %1457  ;;  %v2882_v41 = vld [vmem:[%s3982_s5 + $0x68] sm:$0xff]  }
 0x416   : > { %v1261_v46 = vadd.f32 %v1260_v45, %v1085_v43  ;;  %v1262_v47 = vpop.f32.mrb[41].mxu1 }
 0x417   : > { %v1263_v49 = vadd.f32 %v1262_v47, %v1085_v43  ;;  %v1264_v50 = vpop.f32.mrb[42].mxu1  ;;  %1977 = vmatprep.subr.bf16.mxu0 %v1322_v44  ;;  %2763 = vmatprep.subr.bf16.mxu1 %v1322_v44 }
 0x418   : > { %v1265_v51 = vadd.f32 %v1264_v50, %v1090_v48  ;;  %v1266_v52 = vpop.f32.mrb[43].mxu1  ;;  %1978 = vmatpush1.bf16.msra.mxu0 %v1321_v42  ;;  %2771 = vmatpush1.bf16.msra.mxu1 %v1321_v42  ;;  %v1303_v54 = vmax.f32 %v1261_v46, 0.0  ;;  %v3619_v42 = vpop.permute.xlu1 %1472  ;;  %v2883_v46 = vld [vmem:[%s3982_s5 + $0x70] sm:$0xff]  }
 0x419   : > { %v1267_v53 = vadd.f32 %v1266_v52, %v1090_v48  ;;  %v1304_v56 = vmax.f32 %v1263_v49, 0.0  ;;  %v3621_v43 = vpop.permute.xlu0 %1467  ;;  %v2884_v49 = vld [vmem:[%s3982_s5 + $0x78] sm:$0xff]   ;;  %v2885_v52 = vld [vmem:[%s3982_s5 + $0x80] sm:$0xff]  }
 0x41a   : > { %v1305_v55 = vmax.f32 %v1265_v51, 0.0 }
 0x41b   : > { %v1306_v57 = vmax.f32 %v1267_v53, 0.0 }
 0x41c   : > { %v1323_v58 = vpack.c.bf16 %v1305_v55, %v1303_v54  ;;  %v3624_v44 = vpop.permute.xlu1 %1482 }
 0x41d   : > { %v1324_v60 = vpack.c.bf16 %v1306_v57, %v1304_v56  ;;  %v1270_v61 = vpop.f32.mrb[44].mxu1  ;;  %v3626_v45 = vpop.permute.xlu0 %1477  ;;  %v2886_v57 = vld [vmem:[%s3982_s5 + $0x88] sm:$0xff]  }
 0x41e   : > { %v1271_v62 = vadd.f32 %v1270_v61, %v1095_v59  ;;  %v1272_v63 = vpop.f32.mrb[45].mxu1 }
 0x41f   : > { %v1273_v1 = vadd.f32 %v1272_v63, %v1095_v59  ;;  %v1274_v3 = vpop.f32.mrb[46].mxu1  ;;  %1979 = vmatprep.subr.bf16.mxu0 %v1324_v60  ;;  %2764 = vmatprep.subr.bf16.mxu1 %v1324_v60  ;;  %v2887_v60 = vld [vmem:[%s3982_s5 + $0x90] sm:$0xff]  }
 0x420   : > { %v1275_v4 = vadd.f32 %v1274_v3, %v1100_v0  ;;  %v1276_v5 = vpop.f32.mrb[47].mxu1  ;;  %1980 = vmatpush1.bf16.msra.mxu0 %v1323_v58  ;;  %2772 = vmatpush1.bf16.msra.mxu1 %v1323_v58  ;;  %v1307_v7 = vmax.f32 %v1271_v62, 0.0  ;;  %v3632_v47 = vpop.permute.xlu1 %1492 }
 0x421   : > { %v1277_v6 = vadd.f32 %v1276_v5, %v1100_v0  ;;  %v1308_v9 = vmax.f32 %v1273_v1, 0.0  ;;  %v3634_v48 = vpop.permute.xlu0 %1487 }
 0x422   : > { %v1309_v8 = vmax.f32 %v1275_v4, 0.0 }
 0x423   : > { %v1310_v10 = vmax.f32 %v1277_v6, 0.0 }
 0x424   : > { %v1325_v11 = vpack.c.bf16 %v1309_v8, %v1307_v7  ;;  %v3639_v50 = vpop.permute.xlu1 %1502 }
 0x425   : > { %v1326_v12 = vpack.c.bf16 %v1310_v10, %v1308_v9  ;;  %v3641_v51 = vpop.permute.xlu0 %1497 }
 0x427   : > { %1981 = vmatprep.subr.bf16.mxu0 %v1326_v12  ;;  %2765 = vmatprep.subr.bf16.mxu1 %v1326_v12 }
 0x428   : > { %1982 = vmatpush1.bf16.msra.mxu0 %v1325_v11  ;;  %2773 = vmatpush1.bf16.msra.mxu1 %v1325_v11  ;;  %v3647_v53 = vpop.permute.xlu1 %1512 }
 0x429   : > { %v3649_v54 = vpop.permute.xlu0 %1507 }
 0x42b   : > { %2000 = vmatmul.mubr.bf16.vlgmr.msra.gmra.mrb[32].mxu0 %v2856_v13  ;;  %2190 = vmatmul.mubr.bf16.vlgmr.msra.gmra.mrb[48].mxu1 %v2857_v14 }
 0x42c   : > { %2009 = vmatprep.mubr.bf16.mxu0 %v2968_v2  ;;  %2199 = vmatprep.mubr.bf16.mxu1 %v2968_v2  ;;  %v3652_v55 = vpop.permute.xlu1 %1522 }
 0x42d   : > { %v3654_v56 = vpop.permute.xlu0 %1517 }
 0x430   : > { %v3660_v58 = vpop.permute.xlu1 %1532 }
 0x431   : > { %v3662_v59 = vpop.permute.xlu0 %1527 }
 0x433   : > { %2010 = vmatmul.mubr.bf16.gmra.mrb[36].mxu0 %v2858_v15  ;;  %2200 = vmatmul.mubr.bf16.gmra.mrb[52].mxu1 %v2859_v16 }
 0x434   : > { %2019 = vmatprep.mubr.bf16.mxu0 %v2968_v2  ;;  %2209 = vmatprep.mubr.bf16.mxu1 %v2968_v2  ;;  %v3667_v61 = vpop.permute.xlu1 %1542 }
 0x435   : > { %v3669_v62 = vpop.permute.xlu0 %1537 }
 0x438   : > { %v3671_v63 = vpop.permute.xlu1 %1552 }
 0x439   : > { %v3673_v0 = vpop.permute.xlu0 %1547 }
 0x43b   : > { %2020 = vmatmul.mubr.bf16.gmra.mrb[40].mxu0 %v2860_v17  ;;  %2210 = vmatmul.mubr.bf16.gmra.mrb[56].mxu1 %v2861_v18 }
 0x43c   : > { %2029 = vmatprep.mubr.bf16.mxu0 %v2968_v2  ;;  %2219 = vmatprep.mubr.bf16.mxu1 %v2968_v2  ;;  %v3675_v1 = vpop.permute.xlu1 %1562 }
 0x440   : > { %v3679_v3 = vpop.permute.xlu1 %1572 }
 0x443   : > { %2030 = vmatmul.mubr.bf16.gmra.mrb[44].mxu0 %v2862_v19  ;;  %2220 = vmatmul.mubr.bf16.gmra.mrb[60].mxu1 %v2863_v20 }
 0x444   : > { %2039 = vmatprep.mubr.bf16.mxu0 %v2968_v2  ;;  %2229 = vmatprep.mubr.bf16.mxu1 %v2968_v2  ;;  %v3683_v5 = vpop.permute.xlu1 %1582 }
 0x448   : > { %v3687_v7 = vpop.permute.xlu1 %1592 }
 0x44b   : > { %2040 = vmatmul.mubr.bf16.gmra.mrb[48].mxu0 %v2864_v21  ;;  %2230 = vmatmul.mubr.bf16.gmra.mrb[64].mxu1 %v2865_v22 }
 0x44c   : > { %2049 = vmatprep.mubr.bf16.mxu0 %v2968_v2  ;;  %2239 = vmatprep.mubr.bf16.mxu1 %v2968_v2  ;;  %v3691_v9 = vpop.permute.xlu1 %1602 }
 0x450   : > { %v3695_v11 = vpop.permute.xlu1 %1612 }
 0x453   : > { %2050 = vmatmul.mubr.bf16.gmra.mrb[52].mxu0 %v2866_v23  ;;  %2240 = vmatmul.mubr.bf16.gmra.mrb[68].mxu1 %v2867_v24 }
 0x454   : > { %2059 = vmatprep.mubr.bf16.mxu0 %v2968_v2  ;;  %2249 = vmatprep.mubr.bf16.mxu1 %v2968_v2  ;;  %v3699_v13 = vpop.permute.xlu1 %1622 }
 0x458   : > { %v3703_v15 = vpop.permute.xlu1 %1632 }
 0x45b   : > { %2060 = vmatmul.mubr.bf16.gmra.mrb[56].mxu0 %v2868_v25  ;;  %2250 = vmatmul.mubr.bf16.gmra.mrb[72].mxu1 %v2869_v26 }
 0x45c   : > { %2069 = vmatprep.mubr.bf16.mxu0 %v2968_v2  ;;  %2259 = vmatprep.mubr.bf16.mxu1 %v2968_v2  ;;  %v3707_v17 = vpop.permute.xlu1 %1642 }
 0x460   : > { %v1653_v19 = vpop.permute.xlu1 %1652 }
 0x463   : > { %2070 = vmatmul.mubr.bf16.gmra.mrb[60].mxu0 %v2870_v27  ;;  %2260 = vmatmul.mubr.bf16.gmra.mrb[76].mxu1 %v2871_v28 }
 0x464   : > { %2079 = vmatprep.mubr.bf16.mxu0 %v2968_v2  ;;  %2269 = vmatprep.mubr.bf16.mxu1 %v2968_v2 }
 0x46b   : > { %2080 = vmatmul.mubr.bf16.gmra.mrb[64].mxu0 %v2872_v29  ;;  %2270 = vmatmul.mubr.bf16.gmra.mrb[80].mxu1 %v2873_v30 }
 0x46c   : > { %2089 = vmatprep.mubr.bf16.mxu0 %v2968_v2  ;;  %2279 = vmatprep.mubr.bf16.mxu1 %v2968_v2 }
 0x473   : > { %2090 = vmatmul.mubr.bf16.gmra.mrb[68].mxu0 %v2874_v31  ;;  %2280 = vmatmul.mubr.bf16.gmra.mrb[84].mxu1 %v2875_v32 }
 0x474   : > { %2099 = vmatprep.mubr.bf16.mxu0 %v2968_v2  ;;  %2289 = vmatprep.mubr.bf16.mxu1 %v2968_v2 }
 0x47b   : > { %2100 = vmatmul.mubr.bf16.gmra.mrb[72].mxu0 %v2876_v33  ;;  %2290 = vmatmul.mubr.bf16.gmra.mrb[88].mxu1 %v2877_v34 }
 0x47c   : > { %2109 = vmatprep.mubr.bf16.mxu0 %v2968_v2  ;;  %2299 = vmatprep.mubr.bf16.mxu1 %v2968_v2 }
 0x483   : > { %2110 = vmatmul.mubr.bf16.gmra.mrb[76].mxu0 %v2878_v35  ;;  %2300 = vmatmul.mubr.bf16.gmra.mrb[92].mxu1 %v2879_v36 }
 0x484   : > { %2119 = vmatprep.mubr.bf16.mxu0 %v2968_v2  ;;  %2309 = vmatprep.mubr.bf16.mxu1 %v2968_v2 }
 0x48b   : > { %2120 = vmatmul.mubr.bf16.gmra.mrb[80].mxu0 %v2880_v37  ;;  %2310 = vmatmul.mubr.bf16.gmra.mrb[96].mxu1 %v2881_v38 }
 0x48c   : > { %2129 = vmatprep.mubr.bf16.mxu0 %v2968_v2 }
 0x493   : > { %2130 = vmatmul.mubr.bf16.gmra.mrb[84].mxu0 %v2882_v41 }
 0x494   : > { %2139 = vmatprep.mubr.bf16.mxu0 %v2968_v2 }
 0x49b   : > { %2140 = vmatmul.mubr.bf16.gmra.mrb[88].mxu0 %v2883_v46 }
 0x49c   : > { %2149 = vmatprep.mubr.bf16.mxu0 %v2968_v2 }
 0x4a3   : > { %2150 = vmatmul.mubr.bf16.gmra.mrb[92].mxu0 %v2884_v49 }
 0x4a4   : > { %2159 = vmatprep.mubr.bf16.mxu0 %v2968_v2 }
 0x4ab   : > { %2160 = vmatmul.mubr.bf16.gmra.mrb[96].mxu0 %v2885_v52 }
 0x4ac   : > { %2169 = vmatprep.mubr.bf16.mxu0 %v2968_v2 }
 0x4b3   : > { %2170 = vmatmul.mubr.bf16.gmra.mrb[100].mxu0 %v2886_v57 }
 0x4b4   : > { %2179 = vmatprep.mubr.bf16.mxu0 %v2968_v2  ;;  %v3677_v2 = vpop.permute.xlu0 %1557 }
 0x4b8   : > { %v3681_v4 = vpop.permute.xlu0 %1567 }
 0x4bb   : > { %2180 = vmatmul.mubr.bf16.gmra.mrb[104].mxu0 %v2887_v60 }
 0x4bc   : > { %v3685_v6 = vpop.permute.xlu0 %1577 }
 0x4c0   : > { %v3689_v8 = vpop.permute.xlu0 %1587 }
 0x4c4   : > { %v3693_v10 = vpop.permute.xlu0 %1597 }
 0x4c8   : > { %v3697_v12 = vpop.permute.xlu0 %1607 }
 0x4cc   : > { %v3701_v14 = vpop.permute.xlu0 %1617 }
 0x4d0   : > { %v3705_v16 = vpop.permute.xlu0 %1627 }
 0x4d4   : > { %v3709_v18 = vpop.permute.xlu0 %1637 }
 0x4d8   : > { %v1648_v20 = vpop.permute.xlu0 %1647 }
 0x4dc   : > { %v1658_v60 = vpop.permute.xlu0 %1657 }
 0x4fe   : > { %v2001_v21 = vpop.f32.mrb[32].mxu0  ;;  %v2191_v22 = vpop.f32.mrb[48].mxu1 }
 0x4ff   : > { %v2002_v23 = vadd.f32 %v2001_v21, %v3613_v40  ;;  %v2192_v24 = vadd.f32 %v2191_v22, %v1648_v20  ;;  %v2003_v25 = vpop.f32.mrb[33].mxu0  ;;  %v2193_v26 = vpop.f32.mrb[49].mxu1 }
 0x500   : > { %v2004_v27 = vadd.f32 %v2003_v25, %v3613_v40  ;;  %v2194_v28 = vadd.f32 %v2193_v26, %v1648_v20  ;;  %v2005_v29 = vpop.f32.mrb[34].mxu0  ;;  %v2195_v30 = vpop.f32.mrb[50].mxu1 }
 0x501   : > { %v2320_v31 = vmax.f32 %v2002_v23, 0.0  ;;  %v2396_v32 = vmax.f32 %v2192_v24, 0.0  ;;  %v2006_v33 = vadd.f32 %v2005_v29, %v3611_v39  ;;  %v2196_v34 = vadd.f32 %v2195_v30, %v1653_v19  ;;  %v2007_v35 = vpop.f32.mrb[35].mxu0  ;;  %v2197_v36 = vpop.f32.mrb[51].mxu1 }
 0x502   : > { %v2321_v37 = vmax.f32 %v2004_v27, 0.0  ;;  %v2397_v38 = vmax.f32 %v2194_v28, 0.0  ;;  %v2008_v41 = vadd.f32 %v2007_v35, %v3611_v39  ;;  %v2198_v46 = vadd.f32 %v2197_v36, %v1653_v19  ;;  %v1663_v39 = vpop.permute.xlu1 %1662 }
 0x503   : > { %2448 = vst [vmem:[%s3718_s14] sm:$0xff] %v2320_v31  ;;  %2524 = vst [vmem:[%s3718_s14 + $0x260] sm:$0xff] %v2396_v32  ;;  %v2322_v40 = vmax.f32 %v2006_v33, 0.0  ;;  %v2398_v49 = vmax.f32 %v2196_v34, 0.0 }
 0x504   : > { %2449 = vst [vmem:[%s3718_s14 + $0x8] sm:$0xff] %v2321_v37  ;;  %2525 = vst [vmem:[%s3718_s14 + $0x268] sm:$0xff] %v2397_v38  ;;  %v2323_v52 = vmax.f32 %v2008_v41, 0.0  ;;  %v2399_v57 = vmax.f32 %v2198_v46, 0.0 }
 0x505   : > { %2450 = vst [vmem:[%s3718_s14 + $0x10] sm:$0xff] %v2322_v40  ;;  %2526 = vst [vmem:[%s3718_s14 + $0x270] sm:$0xff] %v2398_v49 }
 0x506   : > { %2451 = vst [vmem:[%s3718_s14 + $0x18] sm:$0xff] %v2323_v52  ;;  %2527 = vst [vmem:[%s3718_s14 + $0x278] sm:$0xff] %v2399_v57  ;;  %v2011_v19 = vpop.f32.mrb[36].mxu0  ;;  %v2201_v20 = vpop.f32.mrb[52].mxu1 }
 0x507   : > { %v2012_v21 = vadd.f32 %v2011_v19, %v3621_v43  ;;  %v2202_v22 = vadd.f32 %v2201_v20, %v1658_v60  ;;  %v2013_v23 = vpop.f32.mrb[37].mxu0  ;;  %v2203_v24 = vpop.f32.mrb[53].mxu1 }
 0x508   : > { %v2014_v25 = vadd.f32 %v2013_v23, %v3621_v43  ;;  %v2204_v26 = vadd.f32 %v2203_v24, %v1658_v60  ;;  %v2015_v27 = vpop.f32.mrb[38].mxu0  ;;  %v2205_v28 = vpop.f32.mrb[54].mxu1 }
 0x509   : > { %v2324_v29 = vmax.f32 %v2012_v21, 0.0  ;;  %v2400_v30 = vmax.f32 %v2202_v22, 0.0  ;;  %v2016_v31 = vadd.f32 %v2015_v27, %v3619_v42  ;;  %v2206_v32 = vadd.f32 %v2205_v28, %v1663_v39  ;;  %v2017_v33 = vpop.f32.mrb[39].mxu0  ;;  %v2207_v34 = vpop.f32.mrb[55].mxu1 }
 0x50a   : > { %v2325_v35 = vmax.f32 %v2014_v25, 0.0  ;;  %v2401_v36 = vmax.f32 %v2204_v26, 0.0  ;;  %v2018_v43 = vadd.f32 %v2017_v33, %v3619_v42  ;;  %v2208_v37 = vadd.f32 %v2207_v34, %v1663_v39  ;;  %v1673_v49 = vpop.permute.xlu1 %1672  ;;  %v1668_v52 = vpop.permute.xlu0 %1667 }
 0x50b   : > { %2452 = vst [vmem:[%s3718_s14 + $0x20] sm:$0xff] %v2324_v29  ;;  %2528 = vst [vmem:[%s3718_s14 + $0x280] sm:$0xff] %v2400_v30  ;;  %v2326_v38 = vmax.f32 %v2016_v31, 0.0  ;;  %v2402_v41 = vmax.f32 %v2206_v32, 0.0 }
 0x50c   : > { %2453 = vst [vmem:[%s3718_s14 + $0x28] sm:$0xff] %v2325_v35  ;;  %2529 = vst [vmem:[%s3718_s14 + $0x288] sm:$0xff] %v2401_v36  ;;  %v2327_v46 = vmax.f32 %v2018_v43, 0.0  ;;  %v2403_v40 = vmax.f32 %v2208_v37, 0.0 }
 0x50d   : > { %2454 = vst [vmem:[%s3718_s14 + $0x30] sm:$0xff] %v2326_v38  ;;  %2530 = vst [vmem:[%s3718_s14 + $0x290] sm:$0xff] %v2402_v41 }
 0x50e   : > { %2455 = vst [vmem:[%s3718_s14 + $0x38] sm:$0xff] %v2327_v46  ;;  %2531 = vst [vmem:[%s3718_s14 + $0x298] sm:$0xff] %v2403_v40  ;;  %v2021_v57 = vpop.f32.mrb[40].mxu0  ;;  %v2211_v60 = vpop.f32.mrb[56].mxu1 }
 0x50f   : > { %v2022_v19 = vadd.f32 %v2021_v57, %v3626_v45  ;;  %v2212_v42 = vadd.f32 %v2211_v60, %v1668_v52  ;;  %v2023_v39 = vpop.f32.mrb[41].mxu0  ;;  %v2213_v20 = vpop.f32.mrb[57].mxu1 }
 0x510   : > { %v2024_v21 = vadd.f32 %v2023_v39, %v3626_v45  ;;  %v2214_v22 = vadd.f32 %v2213_v20, %v1668_v52  ;;  %v2025_v23 = vpop.f32.mrb[42].mxu0  ;;  %v2215_v24 = vpop.f32.mrb[58].mxu1 }
 0x511   : > { %v2328_v25 = vmax.f32 %v2022_v19, 0.0  ;;  %v2404_v26 = vmax.f32 %v2212_v42, 0.0  ;;  %v2026_v27 = vadd.f32 %v2025_v23, %v3624_v44  ;;  %v2216_v28 = vadd.f32 %v2215_v24, %v1673_v49  ;;  %v2027_v29 = vpop.f32.mrb[43].mxu0  ;;  %v2217_v30 = vpop.f32.mrb[59].mxu1 }
 0x512   : > { %v2329_v31 = vmax.f32 %v2024_v21, 0.0  ;;  %v2405_v32 = vmax.f32 %v2214_v22, 0.0  ;;  %v2028_v45 = vadd.f32 %v2027_v29, %v3624_v44  ;;  %v2218_v33 = vadd.f32 %v2217_v30, %v1673_v49  ;;  %v1683_v37 = vpop.permute.xlu1 %1682  ;;  %v1678_v38 = vpop.permute.xlu0 %1677 }
 0x513   : > { %2456 = vst [vmem:[%s3718_s14 + $0x40] sm:$0xff] %v2328_v25  ;;  %2532 = vst [vmem:[%s3718_s14 + $0x2a0] sm:$0xff] %v2404_v26  ;;  %v2330_v34 = vmax.f32 %v2026_v27, 0.0  ;;  %v2406_v35 = vmax.f32 %v2216_v28, 0.0 }
 0x514   : > { %2457 = vst [vmem:[%s3718_s14 + $0x48] sm:$0xff] %v2329_v31  ;;  %2533 = vst [vmem:[%s3718_s14 + $0x2a8] sm:$0xff] %v2405_v32  ;;  %v2331_v36 = vmax.f32 %v2028_v45, 0.0  ;;  %v2407_v43 = vmax.f32 %v2218_v33, 0.0 }
 0x515   : > { %2458 = vst [vmem:[%s3718_s14 + $0x50] sm:$0xff] %v2330_v34  ;;  %2534 = vst [vmem:[%s3718_s14 + $0x2b0] sm:$0xff] %v2406_v35 }
 0x516   : > { %2459 = vst [vmem:[%s3718_s14 + $0x58] sm:$0xff] %v2331_v36  ;;  %2535 = vst [vmem:[%s3718_s14 + $0x2b8] sm:$0xff] %v2407_v43  ;;  %v2031_v41 = vpop.f32.mrb[44].mxu0  ;;  %v2221_v46 = vpop.f32.mrb[60].mxu1 }
 0x517   : > { %v2032_v40 = vadd.f32 %v2031_v41, %v3634_v48  ;;  %v2222_v44 = vadd.f32 %v2221_v46, %v1678_v38  ;;  %v2033_v49 = vpop.f32.mrb[45].mxu0  ;;  %v2223_v52 = vpop.f32.mrb[61].mxu1 }
 0x518   : > { %v2034_v57 = vadd.f32 %v2033_v49, %v3634_v48  ;;  %v2224_v60 = vadd.f32 %v2223_v52, %v1678_v38  ;;  %v2035_v19 = vpop.f32.mrb[46].mxu0  ;;  %v2225_v42 = vpop.f32.mrb[62].mxu1 }
 0x519   : > { %v2332_v39 = vmax.f32 %v2032_v40, 0.0  ;;  %v2408_v20 = vmax.f32 %v2222_v44, 0.0  ;;  %v2036_v21 = vadd.f32 %v2035_v19, %v3632_v47  ;;  %v2226_v22 = vadd.f32 %v2225_v42, %v1683_v37  ;;  %v2037_v23 = vpop.f32.mrb[47].mxu0  ;;  %v2227_v24 = vpop.f32.mrb[63].mxu1 }
 0x51a   : > { %v2333_v25 = vmax.f32 %v2034_v57, 0.0  ;;  %v2409_v26 = vmax.f32 %v2224_v60, 0.0  ;;  %v2038_v48 = vadd.f32 %v2037_v23, %v3632_v47  ;;  %v2228_v27 = vadd.f32 %v2227_v24, %v1683_v37  ;;  %v1693_v32 = vpop.permute.xlu1 %1692  ;;  %v1688_v45 = vpop.permute.xlu0 %1687 }
 0x51b   : > { %2460 = vst [vmem:[%s3718_s14 + $0x60] sm:$0xff] %v2332_v39  ;;  %2536 = vst [vmem:[%s3718_s14 + $0x2c0] sm:$0xff] %v2408_v20  ;;  %v2334_v28 = vmax.f32 %v2036_v21, 0.0  ;;  %v2410_v29 = vmax.f32 %v2226_v22, 0.0 }
 0x51c   : > { %2461 = vst [vmem:[%s3718_s14 + $0x68] sm:$0xff] %v2333_v25  ;;  %2537 = vst [vmem:[%s3718_s14 + $0x2c8] sm:$0xff] %v2409_v26  ;;  %v2335_v30 = vmax.f32 %v2038_v48, 0.0  ;;  %v2411_v31 = vmax.f32 %v2228_v27, 0.0 }
 0x51d   : > { %2462 = vst [vmem:[%s3718_s14 + $0x70] sm:$0xff] %v2334_v28  ;;  %2538 = vst [vmem:[%s3718_s14 + $0x2d0] sm:$0xff] %v2410_v29 }
 0x51e   : > { %2463 = vst [vmem:[%s3718_s14 + $0x78] sm:$0xff] %v2335_v30  ;;  %2539 = vst [vmem:[%s3718_s14 + $0x2d8] sm:$0xff] %v2411_v31  ;;  %v2041_v33 = vpop.f32.mrb[48].mxu0  ;;  %v2231_v34 = vpop.f32.mrb[64].mxu1 }
 0x51f   : > { %v2042_v35 = vadd.f32 %v2041_v33, %v3641_v51  ;;  %v2232_v47 = vadd.f32 %v2231_v34, %v1688_v45  ;;  %v2043_v36 = vpop.f32.mrb[49].mxu0  ;;  %v2233_v43 = vpop.f32.mrb[65].mxu1 }
 0x520   : > { %v2044_v37 = vadd.f32 %v2043_v36, %v3641_v51  ;;  %v2234_v38 = vadd.f32 %v2233_v43, %v1688_v45  ;;  %v2045_v41 = vpop.f32.mrb[50].mxu0  ;;  %v2235_v46 = vpop.f32.mrb[66].mxu1 }
 0x521   : > { %v2336_v40 = vmax.f32 %v2042_v35, 0.0  ;;  %v2412_v44 = vmax.f32 %v2232_v47, 0.0  ;;  %v2046_v49 = vadd.f32 %v2045_v41, %v3639_v50  ;;  %v2236_v52 = vadd.f32 %v2235_v46, %v1693_v32  ;;  %v2047_v57 = vpop.f32.mrb[51].mxu0  ;;  %v2237_v60 = vpop.f32.mrb[67].mxu1 }
 0x522   : > { %v2337_v19 = vmax.f32 %v2044_v37, 0.0  ;;  %v2413_v42 = vmax.f32 %v2234_v38, 0.0  ;;  %v2048_v51 = vadd.f32 %v2047_v57, %v3639_v50  ;;  %v2238_v39 = vadd.f32 %v2237_v60, %v1693_v32  ;;  %v1703_v24 = vpop.permute.xlu1 %1702  ;;  %v1698_v25 = vpop.permute.xlu0 %1697 }
 0x523   : > { %2464 = vst [vmem:[%s3718_s14 + $0x80] sm:$0xff] %v2336_v40  ;;  %2540 = vst [vmem:[%s3718_s14 + $0x2e0] sm:$0xff] %v2412_v44  ;;  %v2338_v20 = vmax.f32 %v2046_v49, 0.0  ;;  %v2414_v21 = vmax.f32 %v2236_v52, 0.0 }
 0x524   : > { %2465 = vst [vmem:[%s3718_s14 + $0x88] sm:$0xff] %v2337_v19  ;;  %2541 = vst [vmem:[%s3718_s14 + $0x2e8] sm:$0xff] %v2413_v42  ;;  %v2339_v22 = vmax.f32 %v2048_v51, 0.0  ;;  %v2415_v23 = vmax.f32 %v2238_v39, 0.0 }
 0x525   : > { %2466 = vst [vmem:[%s3718_s14 + $0x90] sm:$0xff] %v2338_v20  ;;  %2542 = vst [vmem:[%s3718_s14 + $0x2f0] sm:$0xff] %v2414_v21 }
 0x526   : > { %2467 = vst [vmem:[%s3718_s14 + $0x98] sm:$0xff] %v2339_v22  ;;  %2543 = vst [vmem:[%s3718_s14 + $0x2f8] sm:$0xff] %v2415_v23  ;;  %v2051_v26 = vpop.f32.mrb[52].mxu0  ;;  %v2241_v48 = vpop.f32.mrb[68].mxu1 }
 0x527   : > { %v2052_v27 = vadd.f32 %v2051_v26, %v3649_v54  ;;  %v2242_v50 = vadd.f32 %v2241_v48, %v1698_v25  ;;  %v2053_v28 = vpop.f32.mrb[53].mxu0  ;;  %v2243_v29 = vpop.f32.mrb[69].mxu1 }
 0x528   : > { %v2054_v30 = vadd.f32 %v2053_v28, %v3649_v54  ;;  %v2244_v31 = vadd.f32 %v2243_v29, %v1698_v25  ;;  %v2055_v32 = vpop.f32.mrb[54].mxu0  ;;  %v2245_v45 = vpop.f32.mrb[70].mxu1 }
 0x529   : > { %v2340_v33 = vmax.f32 %v2052_v27, 0.0  ;;  %v2416_v34 = vmax.f32 %v2242_v50, 0.0  ;;  %v2056_v35 = vadd.f32 %v2055_v32, %v3647_v53  ;;  %v2246_v47 = vadd.f32 %v2245_v45, %v1703_v24  ;;  %v2057_v36 = vpop.f32.mrb[55].mxu0  ;;  %v2247_v43 = vpop.f32.mrb[71].mxu1 }
 0x52a   : > { %v2341_v37 = vmax.f32 %v2054_v30, 0.0  ;;  %v2417_v38 = vmax.f32 %v2244_v31, 0.0  ;;  %v2058_v54 = vadd.f32 %v2057_v36, %v3647_v53  ;;  %v2248_v41 = vadd.f32 %v2247_v43, %v1703_v24  ;;  %v1713_v52 = vpop.permute.xlu1 %1712  ;;  %v1708_v57 = vpop.permute.xlu0 %1707 }
 0x52b   : > { %2468 = vst [vmem:[%s3718_s14 + $0xa0] sm:$0xff] %v2340_v33  ;;  %2544 = vst [vmem:[%s3718_s14 + $0x300] sm:$0xff] %v2416_v34  ;;  %v2342_v46 = vmax.f32 %v2056_v35, 0.0  ;;  %v2418_v40 = vmax.f32 %v2246_v47, 0.0 }
 0x52c   : > { %2469 = vst [vmem:[%s3718_s14 + $0xa8] sm:$0xff] %v2341_v37  ;;  %2545 = vst [vmem:[%s3718_s14 + $0x308] sm:$0xff] %v2417_v38  ;;  %v2343_v44 = vmax.f32 %v2058_v54, 0.0  ;;  %v2419_v49 = vmax.f32 %v2248_v41, 0.0 }
 0x52d   : > { %2470 = vst [vmem:[%s3718_s14 + $0xb0] sm:$0xff] %v2342_v46  ;;  %2546 = vst [vmem:[%s3718_s14 + $0x310] sm:$0xff] %v2418_v40 }
 0x52e   : > { %2471 = vst [vmem:[%s3718_s14 + $0xb8] sm:$0xff] %v2343_v44  ;;  %2547 = vst [vmem:[%s3718_s14 + $0x318] sm:$0xff] %v2419_v49  ;;  %v2061_v60 = vpop.f32.mrb[56].mxu0  ;;  %v2251_v19 = vpop.f32.mrb[72].mxu1 }
 0x52f   : > { %v2062_v42 = vadd.f32 %v2061_v60, %v3654_v56  ;;  %v2252_v53 = vadd.f32 %v2251_v19, %v1708_v57  ;;  %v2063_v51 = vpop.f32.mrb[57].mxu0  ;;  %v2253_v39 = vpop.f32.mrb[73].mxu1 }
 0x530   : > { %v2064_v20 = vadd.f32 %v2063_v51, %v3654_v56  ;;  %v2254_v21 = vadd.f32 %v2253_v39, %v1708_v57  ;;  %v2065_v22 = vpop.f32.mrb[58].mxu0  ;;  %v2255_v23 = vpop.f32.mrb[74].mxu1 }
 0x531   : > { %v2344_v24 = vmax.f32 %v2062_v42, 0.0  ;;  %v2420_v25 = vmax.f32 %v2252_v53, 0.0  ;;  %v2066_v26 = vadd.f32 %v2065_v22, %v3652_v55  ;;  %v2256_v48 = vadd.f32 %v2255_v23, %v1713_v52  ;;  %v2067_v27 = vpop.f32.mrb[59].mxu0  ;;  %v2257_v50 = vpop.f32.mrb[75].mxu1 }
 0x532   : > { %v2345_v28 = vmax.f32 %v2064_v20, 0.0  ;;  %v2421_v29 = vmax.f32 %v2254_v21, 0.0  ;;  %v2068_v56 = vadd.f32 %v2067_v27, %v3652_v55  ;;  %v2258_v30 = vadd.f32 %v2257_v50, %v1713_v52  ;;  %v1723_v34 = vpop.permute.xlu1 %1722  ;;  %v1718_v35 = vpop.permute.xlu0 %1717 }
 0x533   : > { %2472 = vst [vmem:[%s3718_s14 + $0xc0] sm:$0xff] %v2344_v24  ;;  %2548 = vst [vmem:[%s3718_s14 + $0x320] sm:$0xff] %v2420_v25  ;;  %v2346_v31 = vmax.f32 %v2066_v26, 0.0  ;;  %v2422_v32 = vmax.f32 %v2256_v48, 0.0 }
 0x534   : > { %2473 = vst [vmem:[%s3718_s14 + $0xc8] sm:$0xff] %v2345_v28  ;;  %2549 = vst [vmem:[%s3718_s14 + $0x328] sm:$0xff] %v2421_v29  ;;  %v2347_v45 = vmax.f32 %v2068_v56, 0.0  ;;  %v2423_v33 = vmax.f32 %v2258_v30, 0.0 }
 0x535   : > { %2474 = vst [vmem:[%s3718_s14 + $0xd0] sm:$0xff] %v2346_v31  ;;  %2550 = vst [vmem:[%s3718_s14 + $0x330] sm:$0xff] %v2422_v32 }
 0x536   : > { %2475 = vst [vmem:[%s3718_s14 + $0xd8] sm:$0xff] %v2347_v45  ;;  %2551 = vst [vmem:[%s3718_s14 + $0x338] sm:$0xff] %v2423_v33  ;;  %v2071_v47 = vpop.f32.mrb[60].mxu0  ;;  %v2261_v36 = vpop.f32.mrb[76].mxu1 }
 0x537   : > { %v2072_v43 = vadd.f32 %v2071_v47, %v3662_v59  ;;  %v2262_v55 = vadd.f32 %v2261_v36, %v1718_v35  ;;  %v2073_v37 = vpop.f32.mrb[61].mxu0  ;;  %v2263_v38 = vpop.f32.mrb[77].mxu1 }
 0x538   : > { %v2074_v54 = vadd.f32 %v2073_v37, %v3662_v59  ;;  %v2264_v41 = vadd.f32 %v2263_v38, %v1718_v35  ;;  %v2075_v46 = vpop.f32.mrb[62].mxu0  ;;  %v2265_v40 = vpop.f32.mrb[78].mxu1 }
 0x539   : > { %v2348_v44 = vmax.f32 %v2072_v43, 0.0  ;;  %v2424_v49 = vmax.f32 %v2262_v55, 0.0  ;;  %v2076_v52 = vadd.f32 %v2075_v46, %v3660_v58  ;;  %v2266_v57 = vadd.f32 %v2265_v40, %v1723_v34  ;;  %v2077_v60 = vpop.f32.mrb[63].mxu0  ;;  %v2267_v19 = vpop.f32.mrb[79].mxu1 }
 0x53a   : > { %v2349_v42 = vmax.f32 %v2074_v54, 0.0  ;;  %v2425_v53 = vmax.f32 %v2264_v41, 0.0  ;;  %v2078_v59 = vadd.f32 %v2077_v60, %v3660_v58  ;;  %v2268_v51 = vadd.f32 %v2267_v19, %v1723_v34  ;;  %v1733_v23 = vpop.permute.xlu1 %1732  ;;  %v1728_v24 = vpop.permute.xlu0 %1727 }
 0x53b   : > { %2476 = vst [vmem:[%s3718_s14 + $0xe0] sm:$0xff] %v2348_v44  ;;  %2552 = vst [vmem:[%s3718_s14 + $0x340] sm:$0xff] %v2424_v49  ;;  %v2350_v39 = vmax.f32 %v2076_v52, 0.0  ;;  %v2426_v20 = vmax.f32 %v2266_v57, 0.0 }
 0x53c   : > { %2477 = vst [vmem:[%s3718_s14 + $0xe8] sm:$0xff] %v2349_v42  ;;  %2553 = vst [vmem:[%s3718_s14 + $0x348] sm:$0xff] %v2425_v53  ;;  %v2351_v21 = vmax.f32 %v2078_v59, 0.0  ;;  %v2427_v22 = vmax.f32 %v2268_v51, 0.0 }
 0x53d   : > { %2478 = vst [vmem:[%s3718_s14 + $0xf0] sm:$0xff] %v2350_v39  ;;  %2554 = vst [vmem:[%s3718_s14 + $0x350] sm:$0xff] %v2426_v20 }
 0x53e   : > { %2479 = vst [vmem:[%s3718_s14 + $0xf8] sm:$0xff] %v2351_v21  ;;  %2555 = vst [vmem:[%s3718_s14 + $0x358] sm:$0xff] %v2427_v22  ;;  %v2081_v25 = vpop.f32.mrb[64].mxu0  ;;  %v2271_v26 = vpop.f32.mrb[80].mxu1 }
 0x53f   : > { %v2082_v48 = vadd.f32 %v2081_v25, %v3669_v62  ;;  %v2272_v58 = vadd.f32 %v2271_v26, %v1728_v24  ;;  %v2083_v27 = vpop.f32.mrb[65].mxu0  ;;  %v2273_v50 = vpop.f32.mrb[81].mxu1 }
 0x540   : > { %v2084_v28 = vadd.f32 %v2083_v27, %v3669_v62  ;;  %v2274_v29 = vadd.f32 %v2273_v50, %v1728_v24  ;;  %v2085_v56 = vpop.f32.mrb[66].mxu0  ;;  %v2275_v30 = vpop.f32.mrb[82].mxu1 }
 0x541   : > { %v2352_v31 = vmax.f32 %v2082_v48, 0.0  ;;  %v2428_v32 = vmax.f32 %v2272_v58, 0.0  ;;  %v2086_v45 = vadd.f32 %v2085_v56, %v3667_v61  ;;  %v2276_v33 = vadd.f32 %v2275_v30, %v1733_v23  ;;  %v2087_v34 = vpop.f32.mrb[67].mxu0  ;;  %v2277_v35 = vpop.f32.mrb[83].mxu1 }
 0x542   : > { %v2353_v47 = vmax.f32 %v2084_v28, 0.0  ;;  %v2429_v36 = vmax.f32 %v2274_v29, 0.0  ;;  %v2088_v62 = vadd.f32 %v2087_v34, %v3667_v61  ;;  %v2278_v43 = vadd.f32 %v2277_v35, %v1733_v23  ;;  %v1743_v41 = vpop.permute.xlu1 %1742  ;;  %v1738_v46 = vpop.permute.xlu0 %1737 }
 0x543   : > { %2480 = vst [vmem:[%s3718_s14 + $0x100] sm:$0xff] %v2352_v31  ;;  %2556 = vst [vmem:[%s3718_s14 + $0x360] sm:$0xff] %v2428_v32  ;;  %v2354_v55 = vmax.f32 %v2086_v45, 0.0  ;;  %v2430_v37 = vmax.f32 %v2276_v33, 0.0 }
 0x544   : > { %2481 = vst [vmem:[%s3718_s14 + $0x108] sm:$0xff] %v2353_v47  ;;  %2557 = vst [vmem:[%s3718_s14 + $0x368] sm:$0xff] %v2429_v36  ;;  %v2355_v38 = vmax.f32 %v2088_v62, 0.0  ;;  %v2431_v54 = vmax.f32 %v2278_v43, 0.0 }
 0x545   : > { %2482 = vst [vmem:[%s3718_s14 + $0x110] sm:$0xff] %v2354_v55  ;;  %2558 = vst [vmem:[%s3718_s14 + $0x370] sm:$0xff] %v2430_v37 }
 0x546   : > { %2483 = vst [vmem:[%s3718_s14 + $0x118] sm:$0xff] %v2355_v38  ;;  %2559 = vst [vmem:[%s3718_s14 + $0x378] sm:$0xff] %v2431_v54  ;;  %v2091_v40 = vpop.f32.mrb[68].mxu0  ;;  %v2281_v44 = vpop.f32.mrb[84].mxu1 }
 0x547   : > { %v2092_v49 = vadd.f32 %v2091_v40, %v3673_v0  ;;  %v2282_v61 = vadd.f32 %v2281_v44, %v1738_v46  ;;  %v2093_v52 = vpop.f32.mrb[69].mxu0  ;;  %v2283_v57 = vpop.f32.mrb[85].mxu1 }
 0x548   : > { %v2094_v60 = vadd.f32 %v2093_v52, %v3673_v0  ;;  %v2284_v19 = vadd.f32 %v2283_v57, %v1738_v46  ;;  %v2095_v42 = vpop.f32.mrb[70].mxu0  ;;  %v2285_v53 = vpop.f32.mrb[86].mxu1 }
 0x549   : > { %v2356_v59 = vmax.f32 %v2092_v49, 0.0  ;;  %v2432_v51 = vmax.f32 %v2282_v61, 0.0  ;;  %v2096_v39 = vadd.f32 %v2095_v42, %v3671_v63  ;;  %v2286_v20 = vadd.f32 %v2285_v53, %v1743_v41  ;;  %v2097_v21 = vpop.f32.mrb[71].mxu0  ;;  %v2287_v22 = vpop.f32.mrb[87].mxu1 }
 0x54a   : > { %v2357_v23 = vmax.f32 %v2094_v60, 0.0  ;;  %v2433_v24 = vmax.f32 %v2284_v19, 0.0  ;;  %v2098_v0 = vadd.f32 %v2097_v21, %v3671_v63  ;;  %v2288_v25 = vadd.f32 %v2287_v22, %v1743_v41  ;;  %v1753_v50 = vpop.permute.xlu1 %1752  ;;  %v1748_v28 = vpop.permute.xlu0 %1747 }
 0x54b   : > { %2484 = vst [vmem:[%s3718_s14 + $0x120] sm:$0xff] %v2356_v59  ;;  %2560 = vst [vmem:[%s3718_s14 + $0x380] sm:$0xff] %v2432_v51  ;;  %v2358_v26 = vmax.f32 %v2096_v39, 0.0  ;;  %v2434_v48 = vmax.f32 %v2286_v20, 0.0 }
 0x54c   : > { %2485 = vst [vmem:[%s3718_s14 + $0x128] sm:$0xff] %v2357_v23  ;;  %2561 = vst [vmem:[%s3718_s14 + $0x388] sm:$0xff] %v2433_v24  ;;  %v2359_v58 = vmax.f32 %v2098_v0, 0.0  ;;  %v2435_v27 = vmax.f32 %v2288_v25, 0.0 }
 0x54d   : > { %2486 = vst [vmem:[%s3718_s14 + $0x130] sm:$0xff] %v2358_v26  ;;  %2562 = vst [vmem:[%s3718_s14 + $0x390] sm:$0xff] %v2434_v48 }
 0x54e   : > { %2487 = vst [vmem:[%s3718_s14 + $0x138] sm:$0xff] %v2359_v58  ;;  %2563 = vst [vmem:[%s3718_s14 + $0x398] sm:$0xff] %v2435_v27  ;;  %v2101_v29 = vpop.f32.mrb[72].mxu0  ;;  %v2291_v56 = vpop.f32.mrb[88].mxu1 }
 0x54f   : > { %v2102_v30 = vadd.f32 %v2101_v29, %v3677_v2  ;;  %v2292_v63 = vadd.f32 %v2291_v56, %v1748_v28  ;;  %v2103_v31 = vpop.f32.mrb[73].mxu0  ;;  %v2293_v32 = vpop.f32.mrb[89].mxu1 }
 0x550   : > { %v2104_v45 = vadd.f32 %v2103_v31, %v3677_v2  ;;  %v2294_v33 = vadd.f32 %v2293_v32, %v1748_v28  ;;  %v2105_v34 = vpop.f32.mrb[74].mxu0  ;;  %v2295_v35 = vpop.f32.mrb[90].mxu1 }
 0x551   : > { %v2360_v47 = vmax.f32 %v2102_v30, 0.0  ;;  %v2436_v36 = vmax.f32 %v2292_v63, 0.0  ;;  %v2106_v62 = vadd.f32 %v2105_v34, %v3675_v1  ;;  %v2296_v43 = vadd.f32 %v2295_v35, %v1753_v50  ;;  %v2107_v55 = vpop.f32.mrb[75].mxu0  ;;  %v2297_v37 = vpop.f32.mrb[91].mxu1 }
 0x552   : > { %v2361_v38 = vmax.f32 %v2104_v45, 0.0  ;;  %v2437_v54 = vmax.f32 %v2294_v33, 0.0  ;;  %v2108_v2 = vadd.f32 %v2107_v55, %v3675_v1  ;;  %v2298_v41 = vadd.f32 %v2297_v37, %v1753_v50  ;;  %v1763_v61 = vpop.permute.xlu1 %1762  ;;  %v1758_v52 = vpop.permute.xlu0 %1757 }
 0x553   : > { %2488 = vst [vmem:[%s3718_s14 + $0x140] sm:$0xff] %v2360_v47  ;;  %2564 = vst [vmem:[%s3718_s14 + $0x3a0] sm:$0xff] %v2436_v36  ;;  %v2362_v46 = vmax.f32 %v2106_v62, 0.0  ;;  %v2438_v40 = vmax.f32 %v2296_v43, 0.0 }
 0x554   : > { %2489 = vst [vmem:[%s3718_s14 + $0x148] sm:$0xff] %v2361_v38  ;;  %2565 = vst [vmem:[%s3718_s14 + $0x3a8] sm:$0xff] %v2437_v54  ;;  %v2363_v44 = vmax.f32 %v2108_v2, 0.0  ;;  %v2439_v49 = vmax.f32 %v2298_v41, 0.0 }
 0x555   : > { %2490 = vst [vmem:[%s3718_s14 + $0x150] sm:$0xff] %v2362_v46  ;;  %2566 = vst [vmem:[%s3718_s14 + $0x3b0] sm:$0xff] %v2438_v40 }
 0x556   : > { %2491 = vst [vmem:[%s3718_s14 + $0x158] sm:$0xff] %v2363_v44  ;;  %2567 = vst [vmem:[%s3718_s14 + $0x3b8] sm:$0xff] %v2439_v49  ;;  %v2111_v57 = vpop.f32.mrb[76].mxu0  ;;  %v2301_v60 = vpop.f32.mrb[92].mxu1 }
 0x557   : > { %v2112_v19 = vadd.f32 %v2111_v57, %v3681_v4  ;;  %v2302_v1 = vadd.f32 %v2301_v60, %v1758_v52  ;;  %v2113_v42 = vpop.f32.mrb[77].mxu0  ;;  %v2303_v53 = vpop.f32.mrb[93].mxu1 }
 0x558   : > { %v2114_v59 = vadd.f32 %v2113_v42, %v3681_v4  ;;  %v2304_v51 = vadd.f32 %v2303_v53, %v1758_v52  ;;  %v2115_v39 = vpop.f32.mrb[78].mxu0  ;;  %v2305_v20 = vpop.f32.mrb[94].mxu1 }
 0x559   : > { %v2364_v21 = vmax.f32 %v2112_v19, 0.0  ;;  %v2440_v22 = vmax.f32 %v2302_v1, 0.0  ;;  %v2116_v23 = vadd.f32 %v2115_v39, %v3679_v3  ;;  %v2306_v24 = vadd.f32 %v2305_v20, %v1763_v61  ;;  %v2117_v0 = vpop.f32.mrb[79].mxu0  ;;  %v2307_v25 = vpop.f32.mrb[95].mxu1 }
 0x55a   : > { %v2365_v26 = vmax.f32 %v2114_v59, 0.0  ;;  %v2441_v48 = vmax.f32 %v2304_v51, 0.0  ;;  %v2118_v4 = vadd.f32 %v2117_v0, %v3679_v3  ;;  %v2308_v58 = vadd.f32 %v2307_v25, %v1763_v61  ;;  %v1773_v56 = vpop.permute.xlu1 %1772  ;;  %v1768_v30 = vpop.permute.xlu0 %1767 }
 0x55b   : > { %2492 = vst [vmem:[%s3718_s14 + $0x160] sm:$0xff] %v2364_v21  ;;  %2568 = vst [vmem:[%s3718_s14 + $0x3c0] sm:$0xff] %v2440_v22  ;;  %v2366_v27 = vmax.f32 %v2116_v23, 0.0  ;;  %v2442_v50 = vmax.f32 %v2306_v24, 0.0 }
 0x55c   : > { %2493 = vst [vmem:[%s3718_s14 + $0x168] sm:$0xff] %v2365_v26  ;;  %2569 = vst [vmem:[%s3718_s14 + $0x3c8] sm:$0xff] %v2441_v48  ;;  %v2367_v28 = vmax.f32 %v2118_v4, 0.0  ;;  %v2443_v29 = vmax.f32 %v2308_v58, 0.0 }
 0x55d   : > { %2494 = vst [vmem:[%s3718_s14 + $0x170] sm:$0xff] %v2366_v27  ;;  %2570 = vst [vmem:[%s3718_s14 + $0x3d0] sm:$0xff] %v2442_v50 }
 0x55e   : > { %2495 = vst [vmem:[%s3718_s14 + $0x178] sm:$0xff] %v2367_v28  ;;  %2571 = vst [vmem:[%s3718_s14 + $0x3d8] sm:$0xff] %v2443_v29  ;;  %v2121_v63 = vpop.f32.mrb[80].mxu0  ;;  %v2311_v31 = vpop.f32.mrb[96].mxu1 }
 0x55f   : > { %v2122_v32 = vadd.f32 %v2121_v63, %v3685_v6  ;;  %v2312_v3 = vadd.f32 %v2311_v31, %v1768_v30  ;;  %v2123_v45 = vpop.f32.mrb[81].mxu0  ;;  %v2313_v33 = vpop.f32.mrb[97].mxu1 }
 0x560   : > { %v2124_v34 = vadd.f32 %v2123_v45, %v3685_v6  ;;  %v2314_v35 = vadd.f32 %v2313_v33, %v1768_v30  ;;  %v2125_v47 = vpop.f32.mrb[82].mxu0  ;;  %v2315_v36 = vpop.f32.mrb[98].mxu1 }
 0x561   : > { %v2368_v62 = vmax.f32 %v2122_v32, 0.0  ;;  %v2444_v43 = vmax.f32 %v2312_v3, 0.0  ;;  %v2126_v55 = vadd.f32 %v2125_v47, %v3683_v5  ;;  %v2316_v37 = vadd.f32 %v2315_v36, %v1773_v56  ;;  %v2127_v38 = vpop.f32.mrb[83].mxu0  ;;  %v2317_v54 = vpop.f32.mrb[99].mxu1 }
 0x562   : > { %v2369_v2 = vmax.f32 %v2124_v34, 0.0  ;;  %v2445_v41 = vmax.f32 %v2314_v35, 0.0  ;;  %v2128_v6 = vadd.f32 %v2127_v38, %v3683_v5  ;;  %v2318_v46 = vadd.f32 %v2317_v54, %v1773_v56 }
 0x563   : > { %2496 = vst [vmem:[%s3718_s14 + $0x180] sm:$0xff] %v2368_v62  ;;  %2572 = vst [vmem:[%s3718_s14 + $0x3e0] sm:$0xff] %v2444_v43  ;;  %v2370_v40 = vmax.f32 %v2126_v55, 0.0  ;;  %v2446_v44 = vmax.f32 %v2316_v37, 0.0 }
 0x564   : > { %2497 = vst [vmem:[%s3718_s14 + $0x188] sm:$0xff] %v2369_v2  ;;  %2573 = vst [vmem:[%s3718_s14 + $0x3e8] sm:$0xff] %v2445_v41  ;;  %v2371_v49 = vmax.f32 %v2128_v6, 0.0  ;;  %v2447_v61 = vmax.f32 %v2318_v46, 0.0 }
 0x565   : > { %2498 = vst [vmem:[%s3718_s14 + $0x190] sm:$0xff] %v2370_v40  ;;  %2574 = vst [vmem:[%s3718_s14 + $0x3f0] sm:$0xff] %v2446_v44 }
 0x566   : > { %2499 = vst [vmem:[%s3718_s14 + $0x198] sm:$0xff] %v2371_v49  ;;  %2575 = vst [vmem:[%s3718_s14 + $0x3f8] sm:$0xff] %v2447_v61  ;;  %v2131_v52 = vpop.f32.mrb[84].mxu0 }
 0x567   : > { %v2132_v5 = vadd.f32 %v2131_v52, %v3689_v8  ;;  %v2133_v57 = vpop.f32.mrb[85].mxu0 }
 0x568   : > { %v2134_v60 = vadd.f32 %v2133_v57, %v3689_v8  ;;  %v2135_v19 = vpop.f32.mrb[86].mxu0 }
 0x569   : > { %v2372_v1 = vmax.f32 %v2132_v5, 0.0  ;;  %v2136_v42 = vadd.f32 %v2135_v19, %v3687_v7  ;;  %v2137_v53 = vpop.f32.mrb[87].mxu0 }
 0x56a   : > { %v2373_v59 = vmax.f32 %v2134_v60, 0.0  ;;  %v2138_v51 = vadd.f32 %v2137_v53, %v3687_v7 }
 0x56b   : > { %2500 = vst [vmem:[%s3718_s14 + $0x1a0] sm:$0xff] %v2372_v1  ;;  %v2374_v39 = vmax.f32 %v2136_v42, 0.0 }
 0x56c   : > { %2501 = vst [vmem:[%s3718_s14 + $0x1a8] sm:$0xff] %v2373_v59  ;;  %v2375_v20 = vmax.f32 %v2138_v51, 0.0 }
 0x56d   : > { %2502 = vst [vmem:[%s3718_s14 + $0x1b0] sm:$0xff] %v2374_v39 }
 0x56e   : > { %2503 = vst [vmem:[%s3718_s14 + $0x1b8] sm:$0xff] %v2375_v20  ;;  %v2141_v21 = vpop.f32.mrb[88].mxu0 }
 0x56f   : > { %v2142_v8 = vadd.f32 %v2141_v21, %v3693_v10  ;;  %v2143_v22 = vpop.f32.mrb[89].mxu0 }
 0x570   : > { %v2144_v23 = vadd.f32 %v2143_v22, %v3693_v10  ;;  %v2145_v24 = vpop.f32.mrb[90].mxu0 }
 0x571   : > { %v2376_v0 = vmax.f32 %v2142_v8, 0.0  ;;  %v2146_v7 = vadd.f32 %v2145_v24, %v3691_v9  ;;  %v2147_v25 = vpop.f32.mrb[91].mxu0 }
 0x572   : > { %v2377_v26 = vmax.f32 %v2144_v23, 0.0  ;;  %v2148_v48 = vadd.f32 %v2147_v25, %v3691_v9 }
 0x573   : > { %2504 = vst [vmem:[%s3718_s14 + $0x1c0] sm:$0xff] %v2376_v0  ;;  %v2378_v4 = vmax.f32 %v2146_v7, 0.0 }
 0x574   : > { %2505 = vst [vmem:[%s3718_s14 + $0x1c8] sm:$0xff] %v2377_v26  ;;  %v2379_v58 = vmax.f32 %v2148_v48, 0.0 }
 0x575   : > { %2506 = vst [vmem:[%s3718_s14 + $0x1d0] sm:$0xff] %v2378_v4 }
 0x576   : > { %2507 = vst [vmem:[%s3718_s14 + $0x1d8] sm:$0xff] %v2379_v58  ;;  %v2151_v27 = vpop.f32.mrb[92].mxu0 }
 0x577   : > { %v2152_v10 = vadd.f32 %v2151_v27, %v3697_v12  ;;  %v2153_v50 = vpop.f32.mrb[93].mxu0 }
 0x578   : > { %v2154_v28 = vadd.f32 %v2153_v50, %v3697_v12  ;;  %v2155_v29 = vpop.f32.mrb[94].mxu0 }
 0x579   : > { %v2380_v56 = vmax.f32 %v2152_v10, 0.0  ;;  %v2156_v9 = vadd.f32 %v2155_v29, %v3695_v11  ;;  %v2157_v30 = vpop.f32.mrb[95].mxu0 }
 0x57a   : > { %v2381_v63 = vmax.f32 %v2154_v28, 0.0  ;;  %v2158_v31 = vadd.f32 %v2157_v30, %v3695_v11 }
 0x57b   : > { %2508 = vst [vmem:[%s3718_s14 + $0x1e0] sm:$0xff] %v2380_v56  ;;  %v2382_v32 = vmax.f32 %v2156_v9, 0.0 }
 0x57c   : > { %2509 = vst [vmem:[%s3718_s14 + $0x1e8] sm:$0xff] %v2381_v63  ;;  %v2383_v3 = vmax.f32 %v2158_v31, 0.0 }
 0x57d   : > { %2510 = vst [vmem:[%s3718_s14 + $0x1f0] sm:$0xff] %v2382_v32 }
 0x57e   : > { %2511 = vst [vmem:[%s3718_s14 + $0x1f8] sm:$0xff] %v2383_v3  ;;  %v2161_v45 = vpop.f32.mrb[96].mxu0 }
 0x57f   : > { %v2162_v12 = vadd.f32 %v2161_v45, %v3701_v14  ;;  %v2163_v33 = vpop.f32.mrb[97].mxu0 }
 0x580   : > { %v2164_v34 = vadd.f32 %v2163_v33, %v3701_v14  ;;  %v2165_v35 = vpop.f32.mrb[98].mxu0 }
 0x581   : > { %v2384_v47 = vmax.f32 %v2162_v12, 0.0  ;;  %v2166_v11 = vadd.f32 %v2165_v35, %v3699_v13  ;;  %v2167_v36 = vpop.f32.mrb[99].mxu0 }
 0x582   : > { %v2385_v62 = vmax.f32 %v2164_v34, 0.0  ;;  %v2168_v43 = vadd.f32 %v2167_v36, %v3699_v13 }
 0x583   : > { %2512 = vst [vmem:[%s3718_s14 + $0x200] sm:$0xff] %v2384_v47  ;;  %v2386_v55 = vmax.f32 %v2166_v11, 0.0 }
 0x584   : > { %2513 = vst [vmem:[%s3718_s14 + $0x208] sm:$0xff] %v2385_v62  ;;  %v2387_v37 = vmax.f32 %v2168_v43, 0.0 }
 0x585   : > { %2514 = vst [vmem:[%s3718_s14 + $0x210] sm:$0xff] %v2386_v55 }
 0x586   : > { %2515 = vst [vmem:[%s3718_s14 + $0x218] sm:$0xff] %v2387_v37  ;;  %v2171_v38 = vpop.f32.mrb[100].mxu0 }
 0x587   : > { %v2172_v14 = vadd.f32 %v2171_v38, %v3705_v16  ;;  %v2173_v54 = vpop.f32.mrb[101].mxu0 }
 0x588   : > { %v2174_v2 = vadd.f32 %v2173_v54, %v3705_v16  ;;  %v2175_v41 = vpop.f32.mrb[102].mxu0 }
 0x589   : > { %v2388_v6 = vmax.f32 %v2172_v14, 0.0  ;;  %v2176_v13 = vadd.f32 %v2175_v41, %v3703_v15  ;;  %v2177_v46 = vpop.f32.mrb[103].mxu0 }
 0x58a   : > { %v2389_v40 = vmax.f32 %v2174_v2, 0.0  ;;  %v2178_v44 = vadd.f32 %v2177_v46, %v3703_v15 }
 0x58b   : > { %2516 = vst [vmem:[%s3718_s14 + $0x220] sm:$0xff] %v2388_v6  ;;  %v2390_v49 = vmax.f32 %v2176_v13, 0.0 }
 0x58c   : > { %2517 = vst [vmem:[%s3718_s14 + $0x228] sm:$0xff] %v2389_v40  ;;  %v2391_v61 = vmax.f32 %v2178_v44, 0.0 }
 0x58d   : > { %2518 = vst [vmem:[%s3718_s14 + $0x230] sm:$0xff] %v2390_v49 }
 0x58e   : > { %2519 = vst [vmem:[%s3718_s14 + $0x238] sm:$0xff] %v2391_v61  ;;  %v2181_v52 = vpop.f32.mrb[104].mxu0 }
 0x58f   : > { %v2182_v16 = vadd.f32 %v2181_v52, %v3709_v18  ;;  %v2183_v5 = vpop.f32.mrb[105].mxu0 }
 0x590   : > { %v2184_v57 = vadd.f32 %v2183_v5, %v3709_v18  ;;  %v2185_v60 = vpop.f32.mrb[106].mxu0 }
 0x591   : > { %v2392_v15 = vmax.f32 %v2182_v16, 0.0  ;;  %v2186_v19 = vadd.f32 %v2185_v60, %v3707_v17  ;;  %v2187_v1 = vpop.f32.mrb[107].mxu0 }
 0x592   : > { %v2393_v42 = vmax.f32 %v2184_v57, 0.0  ;;  %v2188_v53 = vadd.f32 %v2187_v1, %v3707_v17 }
 0x593   : > { %2520 = vst [vmem:[%s3718_s14 + $0x240] sm:$0xff] %v2392_v15  ;;  %v2394_v59 = vmax.f32 %v2186_v19, 0.0 }
 0x594   : > { %2521 = vst [vmem:[%s3718_s14 + $0x248] sm:$0xff] %v2393_v42  ;;  %v2395_v18 = vmax.f32 %v2188_v53, 0.0 }
 0x595   : > { %2522 = vst [vmem:[%s3718_s14 + $0x250] sm:$0xff] %v2394_v59 }
 0x596   : > { %2523 = vst [vmem:[%s3718_s14 + $0x258] sm:$0xff] %v2395_v18 }
 0x597   : > { %2901 = shalt.err (!%p2898_p5)
}
 0x598   : > { %s2902_s12 = scalar_lea.hbm %s3922_s26, 16384  ;;  %s2906_s0 = scalar_lea.hbm %s3988_s11, 32768 }
 0x599   : > { %p2903_p6 = scmp.ne.s32.totalorder %s3922_s26, %s2902_s12  ;;  %p2907_p10 = scmp.lt.u32.totalorder %s3922_s26, %s3988_s11 }
 0x59a   : > { %p2908_p11 = scmp.lt.u32.totalorder %s2906_s0, %s2902_s12  ;;  %p2910_p13 = scmp.lt.u32.totalorder %s2902_s12, %s3922_s26 }
 0x59b   : > { %p2904_p7 = pnand %p2903_p6, %p3073_p4 }
 0x59c   : > { %p2909_p12 = por %p2908_p11, %p2907_p10 }
 0x59d   : > { %p2905_p9 = pneg %p2904_p7 }
 0x59e   : > { %p2911_p0 = por %p2910_p13, %p2909_p12 }
 0x5a0   : > { %p2912_p1 = pnand %p2911_p0, %p2905_p9 }
 0x5a2   : > { %2915 = shalt.err (!%p2912_p1)
}
 0x5a3   : > { %s2971_s28 = smov 256   ;;  %s2972_s15 = smov 16  }
 0x5a4   : > { %2774 = dma.vmem_to_hbm [thread:$0]  (%p3073_p4), %s3924_s23, 16384, %s3922_s26, %s3931_s20, %s2971_s28, %s2971_s28, %s2972_s15  }
 0x5a5 PF: > { %p2780_p2 = scmp.ge.s32.totalorder %s2966_s22, 2  ;;  %s2607_s14 = sand.u32 1, %s2946_s17  }
 0x5a6   : > { %s2608_s12 = scalar_lea.sflag [#allocation3], %s2607_s14 }
 0x5a7   : > { %p2777_p3 = pnand %p2780_p2, %p3080_p8 }
 0x5a9   : > { %2941 = dma.done.wait (!%p2777_p3), %s2608_s12, 16384  }
 0x5aa   : > { %2943 = vsyncadd (!%p2777_p3), %s2608_s12, 4294950912  ;;  %s24_s22 = sadd.s32 1, %s2966_s22   ;;  %s3993_s17 = smov %s2950_s18 }
 0x5ab   : > { %p21_p5 = scmp.ge.s32.totalorder %s24_s22, 4   ;;  %s3994_s18 = smov %s2954_s19 }
 0x5ac   : > { %s3995_s19 = smov %s3086_s30  ;;  %s3996_s20 = smov %s2962_s21 }
 0x5ad   : > { %s3997_s21 = smov %s3999_s25  ;;  %23 = sbr.rel (!%p21_p5) target bundleno = 6 (0x6), region = 99 }
 0x5b4   :  { %2613 = vsyncpa [#allocation3], 1 }
 0x5b5   :  { %2615 = vsyncpa [#allocation3 + $0x1], 1 }

</bundles_post_ra>
